<compile_context>
chip_gen: v5e
topology: v5e:2x2
jax: 0.10.0
libtpu: 0.0.40
codegen_flags: <defaults>
</compile_context>

<pallas_src>
import functools
import math

import jax
import jax.numpy as jnp
from jax.experimental import pallas as pl
from jax.experimental.pallas import tpu as pltpu

# ----------------------------------------------------------------------------------
# tiling helpers
# ----------------------------------------------------------------------------------

TM_MAX = 256      # output-row tile
TK_MAX = 1024     # reduction tile
TN_MAX = 640      # output-col tile (multiple of 128; divides 1280/1920/2560/...)
M_ALIGN = 64      # bucket M so many layers share one compiled kernel


def _round_up(x, m):
    return ((x + m - 1) // m) * m


def _tile(d, tmax, align):
    """Return (padded_dim, tile): tile divides padded_dim, tile % align == 0, tile <= tmax."""
    p = _round_up(d, align)
    if p <= tmax:
        return p, p
    lo = max(align, tmax // 2)
    t = (tmax // align) * align
    while t >= lo:
        if p % t == 0:
            return p, t
        t -= align
    return _round_up(d, tmax), tmax


def _seq_tile(t, tmax):
    """Sequence-length padding/tiling for attention (pad to 64-multiples)."""
    if t <= tmax:
        p = _round_up(t, 64)
        return p, p
    return _round_up(t, tmax), tmax


# ----------------------------------------------------------------------------------
# matmul kernel:  y = act(x @ w + b)       x: bf16, w: bf16, y: f32
# ----------------------------------------------------------------------------------

def _mm_kernel(x_ref, w_ref, b_ref, o_ref, *, nk, act):
    k = pl.program_id(2)

    @pl.when(k == 0)
    def _():
        # bias-initialized accumulator (resident across the k axis)
        o_ref[...] = jnp.zeros_like(o_ref) + b_ref[...]

    o_ref[...] += jnp.dot(x_ref[...], w_ref[...], preferred_element_type=jnp.float32)

    if act == "silu":
        @pl.when(k == nk - 1)
        def _():
            y = o_ref[...]
            o_ref[...] = y * (1.0 / (1.0 + jnp.exp(-y)))


@functools.lru_cache(maxsize=None)
def _mm_call(Mp, TM, Kp, TK, Np, TN, act):
    nm, nn, nk = Mp // TM, Np // TN, Kp // TK
    kern = functools.partial(_mm_kernel, nk=nk, act=act)
    f = pl.pallas_call(
        kern,
        out_shape=jax.ShapeDtypeStruct((Mp, Np), jnp.float32),
        grid=(nm, nn, nk),
        in_specs=[
            pl.BlockSpec((TM, TK), lambda m, n, k: (m, k)),
            pl.BlockSpec((TK, TN), lambda m, n, k: (k, n)),
            pl.BlockSpec((1, TN), lambda m, n, k: (0, n)),
        ],
        out_specs=pl.BlockSpec((TM, TN), lambda m, n, k: (m, n)),
        compiler_params=pltpu.CompilerParams(
            dimension_semantics=("parallel", "parallel", "arbitrary"),
            vmem_limit_bytes=32 * 1024 * 1024),
    )
    return jax.jit(f)


def linear(x, w, b=None, act="none"):
    """y = act(x @ w + b).  x: (..., K) any float, w: (K, N) bf16."""
    K, Nout = w.shape
    lead = x.shape[:-1]
    x2 = x.reshape(-1, K).astype(jnp.bfloat16)
    M = x2.shape[0]
    Mp, TM = _tile(M, TM_MAX, M_ALIGN)
    Kp, TK = _tile(K, TK_MAX, 128)
    Np, TN = _tile(Nout, TN_MAX, 128)
    if (Mp, Kp) != (M, K):
        x2 = jnp.pad(x2, ((0, Mp - M), (0, Kp - K)))
    wp = w.astype(jnp.bfloat16)
    if (Kp, Np) != (K, Nout):
        wp = jnp.pad(wp, ((0, Kp - K), (0, Np - Nout)))
    if b is None:
        bp = jnp.zeros((1, Np), jnp.float32)
    else:
        bp = b.astype(jnp.float32)
        if Np != Nout:
            bp = jnp.pad(bp, (0, Np - Nout))
        bp = bp.reshape(1, Np)
    y = _mm_call(Mp, TM, Kp, TK, Np, TN, act)(x2, wp, bp)
    if Mp != M or Np != Nout:
        y = y[:M, :Nout]
    return y.reshape(lead + (Nout,))


# ----------------------------------------------------------------------------------
# GroupNorm kernel (channels-last, group reduce via one-hot matmuls, fused SiLU)
# ----------------------------------------------------------------------------------

def _gn_kernel(x_ref, mask_ref, acg_ref, agc_ref, w_ref, b_ref, o_ref, *, eps, act):
    x = x_ref[0]                           # (HWp, C) f32, zero rows beyond true HW
    mask = mask_ref[...]                   # (HWp, 1)  1.0 valid / 0.0 padded
    sum_c = jnp.sum(x, axis=0, keepdims=True)                       # (1, C)
    gmean = jnp.dot(sum_c, acg_ref[...],                            # (1, G)  (acg already /n)
                    preferred_element_type=jnp.float32)
    mean_c = jnp.dot(gmean, agc_ref[...],                           # (1, C)
                     preferred_element_type=jnp.float32)
    d = (x - mean_c) * mask
    ss_c = jnp.sum(d * d, axis=0, keepdims=True)                    # (1, C)
    gvar = jnp.dot(ss_c, acg_ref[...], preferred_element_type=jnp.float32)
    var_c = jnp.dot(gvar, agc_ref[...], preferred_element_type=jnp.float32)
    y = (x - mean_c) * jax.lax.rsqrt(var_c + eps) * w_ref[...] + b_ref[...]
    if act == "silu":
        y = y * (1.0 / (1.0 + jnp.exp(-y)))
    o_ref[0] = y


@functools.lru_cache(maxsize=None)
def _gn_call(N, HWp, C, G, eps, act):
    kern = functools.partial(_gn_kernel, eps=eps, act=act)
    f = pl.pallas_call(
        kern,
        out_shape=jax.ShapeDtypeStruct((N, HWp, C), jnp.float32),
        grid=(N,),
        in_specs=[
            pl.BlockSpec((1, HWp, C), lambda n: (n, 0, 0)),
            pl.BlockSpec((HWp, 1), lambda n: (0, 0)),
            pl.BlockSpec((C, G), lambda n: (0, 0)),
            pl.BlockSpec((G, C), lambda n: (0, 0)),
            pl.BlockSpec((1, C), lambda n: (0, 0)),
            pl.BlockSpec((1, C), lambda n: (0, 0)),
        ],
        out_specs=pl.BlockSpec((1, HWp, C), lambda n: (n, 0, 0)),
        compiler_params=pltpu.CompilerParams(
            dimension_semantics=("parallel",),
            vmem_limit_bytes=48 * 1024 * 1024),
    )
    return jax.jit(f)


@functools.lru_cache(maxsize=None)
def _group_mats(C, groups, n):
    cg = C // groups
    agc = jnp.repeat(jnp.eye(groups, dtype=jnp.float32), cg, axis=1)   # (G, C)
    acg = agc.T / float(n)                                             # (C, G), folds 1/n
    return acg, agc


@functools.lru_cache(maxsize=None)
def _row_mask(n, npad):
    return jnp.where(jnp.arange(npad) < n, 1.0, 0.0).astype(jnp.float32).reshape(npad, 1)


def group_norm(x, w, b, eps, act="none", groups=32):
    """x: (N, H, W, C) NHWC; contiguous-channel groups (PyTorch semantics)."""
    N, H, W, C = x.shape
    HW = H * W
    HWp = _round_up(HW, 64)
    xg = x.reshape(N, HW, C)
    if HWp != HW:
        xg = jnp.pad(xg, ((0, 0), (0, HWp - HW), (0, 0)))
    acg, agc = _group_mats(C, groups, HW * (C // groups))
    mask = _row_mask(HW, HWp)
    y = _gn_call(N, HWp, C, groups, float(eps), act)(
        xg, mask, acg, agc, w.reshape(1, C), b.reshape(1, C))
    if HWp != HW:
        y = y[:, :HW, :]
    return y.reshape(N, H, W, C)
    # TODO(synk): two-pass HW-tiled statistics for very large H*W (64x64 latents) so a
    # single (HW, C) block never exceeds v7x VMEM.


# ----------------------------------------------------------------------------------
# LayerNorm kernel (row-tiled)
# ----------------------------------------------------------------------------------

def _ln_kernel(x_ref, w_ref, b_ref, o_ref, *, eps):
    x = x_ref[...]
    mean = jnp.mean(x, axis=-1, keepdims=True)
    d = x - mean
    var = jnp.mean(d * d, axis=-1, keepdims=True)
    o_ref[...] = d * jax.lax.rsqrt(var + eps) * w_ref[...] + b_ref[...]


@functools.lru_cache(maxsize=None)
def _ln_call(Mp, TMl, C, eps):
    kern = functools.partial(_ln_kernel, eps=eps)
    f = pl.pallas_call(
        kern,
        out_shape=jax.ShapeDtypeStruct((Mp, C), jnp.float32),
        grid=(Mp // TMl,),
        in_specs=[
            pl.BlockSpec((TMl, C), lambda i: (i, 0)),
            pl.BlockSpec((1, C), lambda i: (0, 0)),
            pl.BlockSpec((1, C), lambda i: (0, 0)),
        ],
        out_specs=pl.BlockSpec((TMl, C), lambda i: (i, 0)),
        compiler_params=pltpu.CompilerParams(
            dimension_semantics=("parallel",),
            vmem_limit_bytes=32 * 1024 * 1024),
    )
    return jax.jit(f)


def layer_norm(x, w, b, eps=1e-5):
    lead = x.shape[:-1]
    C = x.shape[-1]
    x2 = x.reshape(-1, C)
    M = x2.shape[0]
    Mp, TMl = _tile(M, 256, 64)
    if Mp != M:
        x2 = jnp.pad(x2, ((0, Mp - M), (0, 0)))
    y = _ln_call(Mp, TMl, C, float(eps))(x2, w.reshape(1, C), b.reshape(1, C))
    if Mp != M:
        y = y[:M]
    return y.reshape(lead + (C,))


# ----------------------------------------------------------------------------------
# scaled-dot-product attention (flash-style: KV tiling + online softmax + key mask)
# ----------------------------------------------------------------------------------

def _attn_kernel(q_ref, k_ref, v_ref, kmask_ref, o_ref, m_sc, l_sc, acc_sc, *, scale, nl):
    li = pl.program_id(2)

    @pl.when(li == 0)
    def _():
        m_sc[...] = jnp.full_like(m_sc, -1e30)
        l_sc[...] = jnp.zeros_like(l_sc)
        acc_sc[...] = jnp.zeros_like(acc_sc)

    q = q_ref[0]                                    # (TS, dh) bf16
    k = k_ref[0]                                    # (TL, dh) bf16
    v = v_ref[0]                                    # (TL, dh) bf16
    s = jax.lax.dot_general(q, k, (((1,), (1,)), ((), ())),
                            preferred_element_type=jnp.float32) * scale
    s = s + kmask_ref[...]                          # -1e30 on padded keys
    m_prev = m_sc[...]
    m_new = jnp.maximum(m_prev, jnp.max(s, axis=-1, keepdims=True))
    alpha = jnp.exp(m_prev - m_new)
    p = jnp.exp(s - m_new)
    l_sc[...] = alpha * l_sc[...] + jnp.sum(p, axis=-1, keepdims=True)
    acc_sc[...] = alpha * acc_sc[...] + jax.lax.dot_general(
        p.astype(v.dtype), v, (((1,), (0,)), ((), ())),
        preferred_element_type=jnp.float32)
    m_sc[...] = m_new

    @pl.when(li == nl - 1)
    def _():
        o_ref[0] = acc_sc[...] / l_sc[...]


@functools.lru_cache(maxsize=None)
def _attn_call(bh, sp, ts, lp, tl, dh, scale):
    ns, nl = sp // ts, lp // tl
    kern = functools.partial(_attn_kernel, scale=scale, nl=nl)
    f = pl.pallas_call(
        kern,
        out_shape=jax.ShapeDtypeStruct((bh, sp, dh), jnp.float32),
        grid=(bh, ns, nl),
        in_specs=[
            pl.BlockSpec((1, ts, dh), lambda b, s, l: (b, s, 0)),
            pl.BlockSpec((1, tl, dh), lambda b, s, l: (b, l, 0)),
            pl.BlockSpec((1, tl, dh), lambda b, s, l: (b, l, 0)),
            pl.BlockSpec((1, tl), lambda b, s, l: (0, l)),
        ],
        out_specs=pl.BlockSpec((1, ts, dh), lambda b, s, l: (b, s, 0)),
        scratch_shapes=[
            pltpu.VMEM((ts, 1), jnp.float32),
            pltpu.VMEM((ts, 1), jnp.float32),
            pltpu.VMEM((ts, dh), jnp.float32),
        ],
        compiler_params=pltpu.CompilerParams(
            dimension_semantics=("parallel", "parallel", "arbitrary"),
            vmem_limit_bytes=32 * 1024 * 1024),
    )
    return jax.jit(f)


@functools.lru_cache(maxsize=None)
def _key_mask(L, Lp):
    return jnp.where(jnp.arange(Lp) < L, 0.0, -1e30).astype(jnp.float32).reshape(1, Lp)


def multihead_attention(q, k, v, n_heads):
    """q: (B, S, C); k, v: (B, L, C) -> (B, S, C)."""
    B, S, C = q.shape
    L = k.shape[1]
    dh = C // n_heads

    def split(t, T):
        t = t.astype(jnp.bfloat16).reshape(B, T, n_heads, dh)
        return t.transpose(0, 2, 1, 3).reshape(B * n_heads, T, dh)

    qh, kh, vh = split(q, S), split(k, L), split(v, L)
    Sp, TS = _seq_tile(S, 256)
    Lp, TL = _seq_tile(L, 512)
    if Sp != S:
        qh = jnp.pad(qh, ((0, 0), (0, Sp - S), (0, 0)))
    if Lp != L:
        kh = jnp.pad(kh, ((0, 0), (0, Lp - L), (0, 0)))
        vh = jnp.pad(vh, ((0, 0), (0, Lp - L), (0, 0)))
    kmask = _key_mask(L, Lp)
    out = _attn_call(B * n_heads, Sp, TS, Lp, TL, dh, 1.0 / math.sqrt(dh))(qh, kh, vh, kmask)
    out = out[:, :S, :]
    return out.reshape(B, n_heads, S, dh).transpose(0, 2, 1, 3).reshape(B, S, C)
    # TODO(synk): pack multiple heads per program (dh=40/80 under-fills the 128 lanes).


# ----------------------------------------------------------------------------------
# Conv / upsample glue (im2col -> Pallas matmul)
# ----------------------------------------------------------------------------------

def conv2d(x, w, b, stride=1):
    """x: (N, H, W, Cin) NHWC; w: (kh, kw, Cin, Cout); pad=1 for 3x3, 0 for 1x1."""
    kh, kw, cin, cout = w.shape
    if kh == 1:
        return linear(x, w.reshape(cin, cout), b)
    N, H, W, _ = x.shape
    Ho = (H + 2 - 3) // stride + 1
    Wo = (W + 2 - 3) // stride + 1
    xp = jnp.pad(x.astype(jnp.bfloat16), ((0, 0), (1, 1), (1, 1), (0, 0)))
    cols = []
    for dy in range(3):
        for dx in range(3):
            cols.append(xp[:, dy:dy + stride * (Ho - 1) + 1:stride,
                           dx:dx + stride * (Wo - 1) + 1:stride, :])
    patches = jnp.concatenate(cols, axis=-1)        # bf16 (halved vs f32 im2col)
    # TODO(synk): fold the 9 taps into the matmul K grid axis (halo DMA) to avoid the
    # 9x patch materialization at production resolutions.
    return linear(patches, w.reshape(9 * cin, cout), b)


def upsample2(x):
    x = jnp.repeat(x, 2, axis=1)
    return jnp.repeat(x, 2, axis=2)


# ----------------------------------------------------------------------------------
# Deterministic, cheap parameter init (synthetic weights, PyTorch-equivalent shapes)
# ----------------------------------------------------------------------------------

_init_counter = [0]


def _det_values(n, scale=0.02):
    _init_counter[0] += 1
    seed = float(_init_counter[0])
    v = jnp.sin(jnp.arange(n, dtype=jnp.float32) * 0.7381923 + seed * 2.094395)
    return scale * v


def dense_init(din, dout, bias=True):
    w = _det_values(din * dout).reshape(din, dout).astype(jnp.bfloat16)
    b = jnp.zeros((dout,), jnp.float32) if bias else None
    return {"w": w, "b": b}


def conv_init(cin, cout, ksize):
    w = _det_values(ksize * ksize * cin * cout).reshape(ksize, ksize, cin, cout)
    return {"w": w.astype(jnp.bfloat16), "b": jnp.zeros((cout,), jnp.float32)}


def norm_init(c):
    return {"w": jnp.ones((c,), jnp.float32), "b": jnp.zeros((c,), jnp.float32)}


def init_time_embedding(n_embd):
    return {"l1": dense_init(n_embd, 4 * n_embd), "l2": dense_init(4 * n_embd, 4 * n_embd)}


def init_res(cin, cout, n_time=1280):
    p = {"gn_f": norm_init(cin), "conv_f": conv_init(cin, cout, 3),
         "lin_t": dense_init(n_time, cout), "gn_m": norm_init(cout),
         "conv_m": conv_init(cout, cout, 3)}
    if cin != cout:
        p["res"] = conv_init(cin, cout, 1)
    return p


def init_attn(n_head, n_embd, d_context=768):
    C = n_head * n_embd
    return {"n_head": n_head, "gn": norm_init(C), "conv_in": conv_init(C, C, 1),
            "ln1": norm_init(C),
            "a1_in": dense_init(C, 3 * C, bias=False), "a1_out": dense_init(C, C),
            "ln2": norm_init(C),
            "a2_q": dense_init(C, C, bias=False), "a2_k": dense_init(d_context, C, bias=False),
            "a2_v": dense_init(d_context, C, bias=False), "a2_out": dense_init(C, C),
            "ln3": norm_init(C),
            "geglu1": dense_init(C, 4 * C * 2), "geglu2": dense_init(4 * C, C),
            "conv_out": conv_init(C, C, 1)}


def init_unet():
    enc = [
        [("conv", conv_init(4, 320, 3), 1)],
        [("res", init_res(320, 320)), ("attn", init_attn(8, 40))],
        [("res", init_res(320, 320)), ("attn", init_attn(8, 40))],
        [("conv", conv_init(320, 320, 3), 2)],
        [("res", init_res(320, 640)), ("attn", init_attn(8, 80))],
        [("res", init_res(640, 640)), ("attn", init_attn(8, 80))],
        [("conv", conv_init(640, 640, 3), 2)],
        [("res", init_res(640, 1280)), ("attn", init_attn(8, 160))],
        [("res", init_res(1280, 1280)), ("attn", init_attn(8, 160))],
        [("conv", conv_init(1280, 1280, 3), 2)],
        [("res", init_res(1280, 1280))],
        [("res", init_res(1280, 1280))],
    ]
    bottleneck = [("res", init_res(1280, 1280)), ("attn", init_attn(8, 160)),
                  ("res", init_res(1280, 1280))]
    dec = [
        [("res", init_res(2560, 1280))],
        [("res", init_res(2560, 1280))],
        [("res", init_res(2560, 1280)), ("up", conv_init(1280, 1280, 3))],
        [("res", init_res(2560, 1280)), ("attn", init_attn(8, 160))],
        [("res", init_res(2560, 1280)), ("attn", init_attn(8, 160))],
        [("res", init_res(1920, 1280)), ("attn", init_attn(8, 160)), ("up", conv_init(1280, 1280, 3))],
        [("res", init_res(1920, 640)), ("attn", init_attn(8, 80))],
        [("res", init_res(1280, 640)), ("attn", init_attn(8, 80))],
        [("res", init_res(960, 640)), ("attn", init_attn(8, 80)), ("up", conv_init(640, 640, 3))],
        [("res", init_res(960, 320)), ("attn", init_attn(8, 40))],
        [("res", init_res(640, 320)), ("attn", init_attn(8, 40))],
        [("res", init_res(640, 320)), ("attn", init_attn(8, 40))],
    ]
    return {"enc": enc, "bottleneck": bottleneck, "dec": dec}


def init_diffusion():
    return {"time_embedding": init_time_embedding(320),
            "unet": init_unet(),
            "final": {"gn": norm_init(320), "conv": conv_init(320, 4, 3)}}


# ----------------------------------------------------------------------------------
# Forward passes (mirroring the PyTorch module structure)
# ----------------------------------------------------------------------------------

def time_embedding_fwd(p, x):
    x = linear(x, p["l1"]["w"], p["l1"]["b"], act="silu")   # linear_1 + SiLU fused
    return linear(x, p["l2"]["w"], p["l2"]["b"])


def residual_block_fwd(p, feature, time_emb):
    residue = feature
    h = group_norm(feature, p["gn_f"]["w"], p["gn_f"]["b"], eps=1e-5, act="silu")
    h = conv2d(h, p["conv_f"]["w"], p["conv_f"]["b"], stride=1)
    t = jax.nn.silu(time_emb)                                # tiny (1, 1280) glue
    t = linear(t, p["lin_t"]["w"], p["lin_t"]["b"])
    merged = h + t[:, None, None, :]
    m = group_norm(merged, p["gn_m"]["w"], p["gn_m"]["b"], eps=1e-5, act="silu")
    m = conv2d(m, p["conv_m"]["w"], p["conv_m"]["b"], stride=1)
    if "res" in p:
        residue = conv2d(residue, p["res"]["w"], p["res"]["b"], stride=1)
    return m + residue


def attention_block_fwd(p, x, context):
    n_head = p["n_head"]
    N, H, W, C = x.shape
    residue_long = x
    h = group_norm(x, p["gn"]["w"], p["gn"]["b"], eps=1e-6, act="none")
    h = conv2d(h, p["conv_in"]["w"], p["conv_in"]["b"], stride=1)
    h = h.reshape(N, H * W, C)

    res = h
    hn = layer_norm(h, p["ln1"]["w"], p["ln1"]["b"])
    qkv = linear(hn, p["a1_in"]["w"], None)
    q, k, v = jnp.split(qkv, 3, axis=-1)
    a = multihead_attention(q, k, v, n_head)
    a = linear(a, p["a1_out"]["w"], p["a1_out"]["b"])
    h = a + res

    res = h
    hn = layer_norm(h, p["ln2"]["w"], p["ln2"]["b"])
    q = linear(hn, p["a2_q"]["w"], None)
    k = linear(context, p["a2_k"]["w"], None)
    v = linear(context, p["a2_v"]["w"], None)
    a = multihead_attention(q, k, v, n_head)
    a = linear(a, p["a2_out"]["w"], p["a2_out"]["b"])
    h = a + res

    res = h
    hn = layer_norm(h, p["ln3"]["w"], p["ln3"]["b"])
    gg = linear(hn, p["geglu1"]["w"], p["geglu1"]["b"])
    xg, gate = jnp.split(gg, 2, axis=-1)
    # TODO(synk): exact-erf GELU gate kept as plain-JAX elementwise glue.
    h2 = xg * jax.nn.gelu(gate, approximate=False)
    h2 = linear(h2, p["geglu2"]["w"], p["geglu2"]["b"])
    h = h2 + res

    h = h.reshape(N, H, W, C)
    return conv2d(h, p["conv_out"]["w"], p["conv_out"]["b"], stride=1) + residue_long


def switch_sequential_fwd(layers, x, context, time_emb):
    for layer in layers:
        kind = layer[0]
        if kind == "conv":
            _, p, stride = layer
            x = conv2d(x, p["w"], p["b"], stride=stride)
        elif kind == "res":
            x = residual_block_fwd(layer[1], x, time_emb)
        elif kind == "attn":
            x = attention_block_fwd(layer[1], x, context)
        elif kind == "up":
            x = upsample2(x)
            x = conv2d(x, layer[1]["w"], layer[1]["b"], stride=1)
    return x


def unet_fwd(p, x, context, time_emb):
    skips = []
    for layers in p["enc"]:
        x = switch_sequential_fwd(layers, x, context, time_emb)
        skips.append(x)
    x = switch_sequential_fwd(p["bottleneck"], x, context, time_emb)
    for layers in p["dec"]:
        x = jnp.concatenate([x, skips.pop()], axis=-1)       # torch.cat(dim=1) in NHWC
        x = switch_sequential_fwd(layers, x, context, time_emb)
    return x


def output_layer_fwd(p, x):
    x = group_norm(x, p["gn"]["w"], p["gn"]["b"], eps=1e-5, act="silu")
    return conv2d(x, p["conv"]["w"], p["conv"]["b"], stride=1)


def diffusion_forward(params, latent_nchw, context, time):
    t = time_embedding_fwd(params["time_embedding"], time)   # (1, 1280)
    x = jnp.transpose(latent_nchw, (0, 2, 3, 1))              # NCHW -> NHWC
    x = unet_fwd(params["unet"], x, context, t)
    x = output_layer_fwd(params["final"], x)
    return jnp.transpose(x, (0, 3, 1, 2))                     # NHWC -> NCHW


# ----------------------------------------------------------------------------------

if __name__ == "__main__":
    key = jax.random.PRNGKey(0)
    # small shapes consistent with the module: latent (N, 4, H, W) with H, W divisible by 8,
    # context (N, seq, 768), time (1, 320)
    latent = jax.random.normal(jax.random.fold_in(key, 1), (1, 4, 8, 8), jnp.float32)
    context = jax.random.normal(jax.random.fold_in(key, 2), (1, 8, 768), jnp.float32)
    time = jax.random.normal(jax.random.fold_in(key, 3), (1, 320), jnp.float32)

    params = init_diffusion()
    out = diffusion_forward(params, latent, context, time)
    out = jax.block_until_ready(out)

    assert out.shape == (1, 4, 8, 8), out.shape
    assert bool(jnp.all(jnp.isfinite(out)))
    print("KERNEL_OK")
</pallas_src>

<mosaic_0001>
module attributes {stable_mosaic.version = 11 : i64} {
  func.func @_mm_kernel(%arg0: i32, %arg1: i32, %arg2: i32, %arg3: memref<64x384xbf16, #tpu.memory_space<vmem>>, %arg4: memref<384x640xbf16, #tpu.memory_space<vmem>>, %arg5: memref<1x640xf32, #tpu.memory_space<vmem>>, %arg6: memref<64x640xf32, #tpu.memory_space<vmem>>) attributes {dimension_semantics = [#tpu.dimension_semantics<parallel>, #tpu.dimension_semantics<parallel>, #tpu.dimension_semantics<arbitrary>], iteration_bounds = array<i64: 1, 2, 1>, scalar_prefetch = 0 : i64, scratch_operands = 0 : i64, tpu.core_type = #tpu.core_type<tc>, window_params = [{transform_indices = @transform_0, window_bounds = array<i64: 64, 384>}, {transform_indices = @transform_1, window_bounds = array<i64: 384, 640>}, {transform_indices = @transform_2, window_bounds = array<i64: 1, 640>}, {transform_indices = @transform_3, window_bounds = array<i64: 64, 640>}]} {
    %c0_i32 = arith.constant 0 : i32
    %0 = arith.cmpi eq, %arg2, %c0_i32 : i32
    %1 = arith.extui %0 : i1 to i32
    %c0_i32_0 = arith.constant 0 : i32
    %2 = arith.cmpi ne, %1, %c0_i32_0 : i32
    scf.if %2 {
      %cst_10 = arith.constant 0.000000e+00 : f32
      %12 = vector.broadcast %cst_10 : f32 to vector<64x640xf32>
      %c0_11 = arith.constant 0 : index
      %c0_12 = arith.constant 0 : index
      %13 = vector.load %arg5[%c0_11, %c0_12] : memref<1x640xf32, #tpu.memory_space<vmem>>, vector<1x640xf32>
      %14 = vector.broadcast %13 : vector<1x640xf32> to vector<64x640xf32>
      %15 = arith.addf %12, %14 : vector<64x640xf32>
      %c0_13 = arith.constant 0 : index
      %c0_14 = arith.constant 0 : index
      %16 = vector.load %arg6[%c0_13, %c0_14] : memref<64x640xf32, #tpu.memory_space<vmem>>, vector<64x640xf32>
      tpu.vector_store %arg6[%c0_13, %c0_14], %15 {strides = array<i32>} : memref<64x640xf32, #tpu.memory_space<vmem>>, vector<64x640xf32>,
    } else {
    }
    %c0 = arith.constant 0 : index
    %c0_1 = arith.constant 0 : index
    %3 = vector.load %arg6[%c0, %c0_1] : memref<64x640xf32, #tpu.memory_space<vmem>>, vector<64x640xf32>
    %c0_2 = arith.constant 0 : index
    %c0_3 = arith.constant 0 : index
    %4 = vector.load %arg3[%c0_2, %c0_3] : memref<64x384xbf16, #tpu.memory_space<vmem>>, vector<64x384xbf16>
    %c0_4 = arith.constant 0 : index
    %c0_5 = arith.constant 0 : index
    %5 = vector.load %arg4[%c0_4, %c0_5] : memref<384x640xbf16, #tpu.memory_space<vmem>>, vector<384x640xbf16>
    %cst = arith.constant dense<0.000000e+00> : vector<64x640xf32>
    %6 = tpu.matmul %4, %5, %cst {dimension_numbers = #tpu.dot_dimension_numbers<[1], [0], [0], [1], [0, 0, 1, 1], [], []>} : vector<64x384xbf16>, vector<384x640xbf16>, vector<64x640xf32> -> vector<64x640xf32>
    %7 = arith.addf %3, %6 : vector<64x640xf32>
    %c0_6 = arith.constant 0 : index
    %c0_7 = arith.constant 0 : index
    %8 = vector.load %arg6[%c0_6, %c0_7] : memref<64x640xf32, #tpu.memory_space<vmem>>, vector<64x640xf32>
    tpu.vector_store %arg6[%c0_6, %c0_7], %7 {strides = array<i32>} : memref<64x640xf32, #tpu.memory_space<vmem>>, vector<64x640xf32>,
    %c0_i32_8 = arith.constant 0 : i32
    %9 = arith.cmpi eq, %arg2, %c0_i32_8 : i32
    %10 = arith.extui %9 : i1 to i32
    %c0_i32_9 = arith.constant 0 : i32
    %11 = arith.cmpi ne, %10, %c0_i32_9 : i32
    scf.if %11 {
      %c0_10 = arith.constant 0 : index
      %c0_11 = arith.constant 0 : index
      %12 = vector.load %arg6[%c0_10, %c0_11] : memref<64x640xf32, #tpu.memory_space<vmem>>, vector<64x640xf32>
      %cst_12 = arith.constant 0.000000e+00 : f32
      %13 = vector.broadcast %cst_12 : f32 to vector<64x640xf32>
      %14 = arith.subf %13, %12 : vector<64x640xf32>
      %15 = math.exp %14 : vector<64x640xf32>
      %cst_13 = arith.constant 1.000000e+00 : f32
      %16 = vector.broadcast %cst_13 : f32 to vector<64x640xf32>
      %17 = arith.addf %16, %15 : vector<64x640xf32>
      %cst_14 = arith.constant 1.000000e+00 : f32
      %18 = vector.broadcast %cst_14 : f32 to vector<64x640xf32>
      %19 = arith.divf %18, %17 : vector<64x640xf32>
      %20 = arith.mulf %12, %19 : vector<64x640xf32>
      %c0_15 = arith.constant 0 : index
      %c0_16 = arith.constant 0 : index
      %21 = vector.load %arg6[%c0_15, %c0_16] : memref<64x640xf32, #tpu.memory_space<vmem>>, vector<64x640xf32>
      tpu.vector_store %arg6[%c0_15, %c0_16], %20 {strides = array<i32>} : memref<64x640xf32, #tpu.memory_space<vmem>>, vector<64x640xf32>,
    } else {
    }
    return
  }
  func.func @transform_0(%arg0: i32, %arg1: i32, %arg2: i32) -> (i32, i32) {
    %c0_i32 = arith.constant 0 : i32
    return %arg0, %arg2 : i32, i32
  }
  func.func @transform_1(%arg0: i32, %arg1: i32, %arg2: i32) -> (i32, i32) {
    %c0_i32 = arith.constant 0 : i32
    return %arg2, %arg1 : i32, i32
  }
  func.func @transform_2(%arg0: i32, %arg1: i32, %arg2: i32) -> (i32, i32) {
    %c0_i32 = arith.constant 0 : i32
    %c0_i32_0 = arith.constant 0 : i32
    return %c0_i32, %arg1 : i32, i32
  }
  func.func @transform_3(%arg0: i32, %arg1: i32, %arg2: i32) -> (i32, i32) {
    %c0_i32 = arith.constant 0 : i32
    return %arg0, %arg1 : i32, i32
  }
}

</mosaic_0001>

<bundles_post_ra>
// kernel: tpu_custom_call.1
= control target key start
LH: loop header
LB: loop body
LE: loop exit
PB: predicated region body
PF: predicated region fallthrough
CT: control target
= control target key end

     0   :  { %s5220_s0 = inlined_call_operand.hbm [shape: bf16[64,384], index: 0, kind: input, shape index: {}]   ;;  %s5221_s1 = inlined_call_operand.hbm [shape: bf16[384,1280], index: 1, kind: input, shape index: {}]   ;;  %s5222_s2 = inlined_call_operand.hbm [shape: f32[1,1280], index: 2, kind: input, shape index: {}]   ;;  %s5223_s3 = inlined_call_operand.hbm [shape: f32[64,1280], index: 3, kind: output, shape index: {}]  }
   0x1   :  { %5224 = sst [smem:[#allocation12_spill]] %s5220_s0 }
   0x2   :  { %5225 = sst [smem:[#allocation13_spill]] %s5221_s1 }
   0x3   :  { %8 = vsyncpa [#allocation3], 0 }
   0x4   :  { %9 = vsyncpa [#allocation6], 0 }
   0x5   :  { %11 = vsyncpa [#allocation6 + $0x1], 0 }
   0x6   :  { %12 = vsyncpa [#allocation4], 0 }
   0x7   :  { %14 = vsyncpa [#allocation4 + $0x1], 0  ;;  %s3939_s12 = smov 0   ;;  %s3941_s13 = smov 0  }
   0x8   :  { %s3943_s14 = smov 0   ;;  %s3945_s15 = smov 0  }
   0x9   :  { %s3947_s16 = smov 0   ;;  %s3949_s17 = smov 0  }
   0xa LB: > { %s35_s18 = sadd.s32 1, %s3904_s16  ;;  %s76_s19 = sadd.s32 1, %s3896_s14  ;;  %s3908_s17 = sphi %s3949_s17, %s20_s17   ;;  %s3904_s16 = sphi %s3947_s16, %s5259_s16   ;;  %s3900_s15 = sphi %s3945_s15, %s5258_s15   ;;  %s3896_s14 = sphi %s3943_s14, %s5257_s14   ;;  %s3892_s13 = sphi %s3941_s13, %s5256_s13   ;;  %s3888_s12 = sphi %s3939_s12, %s5255_s12  }
   0xb   : > { %p37_p0 = scmp.ge.s32.totalorder %s35_s18, 2  ;;  %p83_p1 = scmp.ne.s32.totalorder %s3896_s14, %s3892_s13 }
   0xc   : > { %p84_p2 = scmp.eq.s32.totalorder %s3908_s17, 0  ;;  %p2787_p3 = scmp.ge.s32.totalorder %s3908_s17, 2 }
   0xd   : > { %s5261_s18 = smov (%p37_p0, %s35_s18), 0  ;;  %p3511_p5 = scmp.lt.s32.totalorder %s3908_s17, 2 }
   0xe   : > { %p85_p4 = por %p84_p2, %p83_p1  ;;  %s72_s20 = ssub.s32 %s3904_s16, %s5261_s18 }
   0xf   : > { %s187_s21 = sand.u32 1, %s3908_s17   ;;  %p74_p6 = scmp.eq.s32.totalorder %s72_s20, 0 }
  0x10   : > { %s189_s22 = sand.u32 1, %s3896_s14   ;;  %s3322_s23 = smul.u32 20, %s3904_s16 }
  0x11   : > { %s3987_s24 = scalar_select %p74_p6, %s3896_s14, %s76_s19  }
  0x12   : > { %s3480_s25 = smul.u32 960, %s189_s22  ;;  %s5226_s1 = sld [smem:[#allocation13_spill]] }
  0x13   : > { %p3994_p7 = pnand %p3511_p5, %p85_p4  ;;  %s3998_s6 = scalar_lea.sflag [#allocation6], %s187_s21 }
  0x14   : > { %s191_s4 = scalar_lea.vmem [#allocation5], %s3480_s25  ;;  %s3910_s7 = smov 640  }
  0x15   : > { %s202_s5 = sshll.u32 %s191_s4, 4  ;;  %s3911_s8 = smov 320   ;;  %s203_s5 = int_to_ptr.vmem [resolvable:$true] %s202_s5 }
  0x16   : > { %s3912_s9 = smov 20   ;;  %s4004_s10 = sadd.s32 4294967295, %s3908_s17  }
  0x17   : > { %s2784_s11 = sadd.s32 4294967294, %s3908_s17   ;;  %p89_p8 = scmp.ne.s32.totalorder %s3892_s13, %s3888_s12 }
  0x18   : > { %s199_s28 = scalar_lea.hbm %s5226_s1, %s3322_s23  ;;  %p90_p9 = scmp.eq.s32.totalorder %s4004_s10, 0 }
  0x19   : > { %s200_s29 = sshll.u32 %s199_s28, 4  ;;  %p141_p10 = scmp.eq.s32.totalorder %s4004_s10, 1  ;;  %s201_s29 = int_to_ptr.hbm [resolvable:$true] %s200_s29 }
  0x1a   : > { %3502 = dma.hbm_to_vmem [thread:$0]  (!%p3994_p7), %s201_s29, 15360, %s203_s5, %s3998_s6, %s3910_s7, %s3911_s8, %s3912_s9  }
  0x1b   : > { %p147_p11 = scmp.eq.s32.totalorder %s2784_s11, 1  ;;  %p4013_p12 = por %p90_p9, %p89_p8 }
  0x1c   : > { %p2785_p13 = scmp.ge.s32.totalorder %s3908_s17, 1  ;;  %p4021_p0 = por %p141_p10, %p83_p1 }
  0x1d   : > { %p4025_p2 = por %p147_p11, %p89_p8  ;;  %p154_p4 = scmp.lt.s32.totalorder %s3908_s17, 3 }
  0x1e   : > { %s5231_s0 = sld [smem:[#allocation12_spill]]  ;;  %s3913_s28 = smov [#allocation2]  }
  0x1f   : > { %p4033_p5 = pnand %p2785_p13, %p154_p4  ;;  %s173_s29 = sshll.u32 %s3913_s28, 4  ;;  %s174_s29 = int_to_ptr.vmem [resolvable:$true] %s173_s29 }
  0x20   : > { %s3481_s4 = smul.u32 5, %s189_s22  ;;  %s3914_s11 = smov 192  }
  0x21   : > { %p3495_p1 = pneg %p4033_p5  ;;  %s217_s5 = smul.u32 5, %s3904_s16 }
  0x22   : > { %s3915_s23 = smov 12  }
  0x23   : > { %p3496_p6 = pnand %p3495_p1, %p90_p9  ;;  %s220_s9 = scalar_lea.hbm %s5222_s2, %s217_s5 }
  0x24   : > { %s171_s26 = sshll.u32 %s5231_s0, 4  ;;  %s222_s25 = sshll.u32 %s220_s9, 4  ;;  %s172_s26 = int_to_ptr.hbm [resolvable:$true] %s171_s26  ;;  %s223_s25 = int_to_ptr.hbm [resolvable:$true] %s222_s25 }
  0x25   : > { %3498 = dma.hbm_to_vmem [thread:$0]  (!%p3496_p6), %s172_s26, 1536, %s174_s29, [#allocation3], %s3914_s11, %s3914_s11, %s3915_s23  }
  0x26   : > { %s216_s0 = scalar_lea.vmem [#allocation7], %s3481_s4  ;;  %233 = sbr.rel (%p4033_p5) target bundleno = 501 (0x1f5), region = 32 }
  0x27   : > { %s224_s1 = sshll.u32 %s216_s0, 4  ;;  %s225_s1 = int_to_ptr.vmem [resolvable:$true] %s224_s1 }
  0x28   : > { %3505 = dma.hbm_to_vmem [thread:$0]  (!%p3994_p7), %s223_s25, 80, %s225_s1, %s3998_s6  }
  0x2b   : > { %3875 = dma.done.wait (%p90_p9), [#allocation3], 1536  }
  0x2c   : > { %3877 = vsyncadd (%p90_p9), [#allocation3], 4294965760  ;;  %s240_s22 = sand.u32 1, %s4004_s10   ;;  %s4058_s26 = sand.u32 1, %s3892_s13  }
  0x2d   : > { %s3482_s0 = smul.u32 960, %s4058_s26  ;;  %s241_s28 = scalar_lea.sflag [#allocation6], %s240_s22 }
  0x2f   : > { %s4061_s30 = scalar_lea.vmem [#allocation5], %s3482_s0 }
  0x30   : > { %3879 = dma.done.wait (%p4013_p12), %s241_s28, 15440  }
  0x31   : > { %3881 = vsyncadd (%p4013_p12), %s241_s28, 4294951856  ;;  %v2981_v0 = vld [vmem:[%s4061_s30 + $0x118] sm:$0xf]  ;;  %v3372_v1 = vld [vmem:[%s4061_s30 + $0x128] sm:$0xf0]  ;;  %s3483_s1 = smul.u32 5, %s4058_s26 }
  0x32   : > { %v3141_v2 = vld [vmem:[%s4061_s30 + $0x258] sm:$0xf]  ;;  %v2982_v3 = vor.u32 %v3372_v1, %v2981_v0  ;;  %v3412_v4 = vld [vmem:[%s4061_s30 + $0x268] sm:$0xf0]  ;;  %v2961_v9 = vld [vmem:[%s4061_s30 + $0xf0] sm:$0xf] }
  0x33   : > { %v3301_v5 = vld [vmem:[%s4061_s30 + $0x398] sm:$0xf]  ;;  %v3452_v6 = vld [vmem:[%s4061_s30 + $0x3a8] sm:$0xf0]  ;;  %v3142_v7 = vor.u32 %v3412_v4, %v3141_v2  ;;  %v3367_v10 = vld [vmem:[%s4061_s30 + $0x100] sm:$0xf0] }
  0x34   : > { %v3302_v8 = vor.u32 %v3452_v6, %v3301_v5  ;;  %v3121_v11 = vld [vmem:[%s4061_s30 + $0x230] sm:$0xf]  ;;  %1239 = vmatpush.bf16.msra.mxu0 %v2982_v3  ;;  %3456 = vmatpush.bf16.msra.mxu3 %v2982_v3  ;;  %v2962_v12 = vor.u32 %v3367_v10, %v2961_v9  ;;  %v3407_v13 = vld [vmem:[%s4061_s30 + $0x240] sm:$0xf0]  ;;  %v2941_v18 = vld [vmem:[%s4061_s30 + $0xc8] sm:$0xf] }
  0x35   : > { %v3281_v14 = vld [vmem:[%s4061_s30 + $0x370] sm:$0xf]  ;;  %v3447_v15 = vld [vmem:[%s4061_s30 + $0x380] sm:$0xf0]  ;;  %1268 = vmatpush.bf16.msra.mxu1 %v3142_v7  ;;  %v3122_v16 = vor.u32 %v3407_v13, %v3121_v11  ;;  %v3362_v19 = vld [vmem:[%s4061_s30 + $0xd8] sm:$0xf0] }
  0x36   : > { %1297 = vmatpush.bf16.msra.mxu2 %v3302_v8  ;;  %v3282_v17 = vor.u32 %v3447_v15, %v3281_v14  ;;  %v3101_v20 = vld [vmem:[%s4061_s30 + $0x208] sm:$0xf]  ;;  %v3402_v21 = vld [vmem:[%s4061_s30 + $0x218] sm:$0xf0]  ;;  %v2942_v24 = vor.u32 %v3362_v19, %v2941_v18  ;;  %v2921_v27 = vld [vmem:[%s4061_s30 + $0xa0] sm:$0xf] }
  0x37   : > { %v3261_v22 = vld [vmem:[%s4061_s30 + $0x348] sm:$0xf]  ;;  %v3442_v23 = vld [vmem:[%s4061_s30 + $0x358] sm:$0xf0]  ;;  %v3102_v25 = vor.u32 %v3402_v21, %v3101_v20  ;;  %v3357_v28 = vld [vmem:[%s4061_s30 + $0xb0] sm:$0xf0] }
  0x38   : > { %1240 = vmatpush.bf16.msra.mxu0 %v2962_v12  ;;  %3457 = vmatpush.bf16.msra.mxu3 %v2962_v12  ;;  %v3262_v26 = vor.u32 %v3442_v23, %v3261_v22  ;;  %v3081_v29 = vld [vmem:[%s4061_s30 + $0x1e0] sm:$0xf]  ;;  %v3397_v30 = vld [vmem:[%s4061_s30 + $0x1f0] sm:$0xf0]  ;;  %v2922_v33 = vor.u32 %v3357_v28, %v2921_v27  ;;  %v2901_v36 = vld [vmem:[%s4061_s30 + $0x78] sm:$0xf] }
  0x39   : > { %1269 = vmatpush.bf16.msra.mxu1 %v3122_v16  ;;  %v3241_v31 = vld [vmem:[%s4061_s30 + $0x320] sm:$0xf]  ;;  %v3437_v32 = vld [vmem:[%s4061_s30 + $0x330] sm:$0xf0]  ;;  %v3082_v34 = vor.u32 %v3397_v30, %v3081_v29  ;;  %v3352_v37 = vld [vmem:[%s4061_s30 + $0x88] sm:$0xf0] }
  0x3a   : > { %1298 = vmatpush.bf16.msra.mxu2 %v3282_v17  ;;  %v3242_v35 = vor.u32 %v3437_v32, %v3241_v31  ;;  %v3061_v38 = vld [vmem:[%s4061_s30 + $0x1b8] sm:$0xf]  ;;  %v3392_v39 = vld [vmem:[%s4061_s30 + $0x1c8] sm:$0xf0]  ;;  %v2902_v42 = vor.u32 %v3352_v37, %v2901_v36  ;;  %v2881_v45 = vld [vmem:[%s4061_s30 + $0x50] sm:$0xf] }
  0x3b   : > { %v3221_v40 = vld [vmem:[%s4061_s30 + $0x2f8] sm:$0xf]  ;;  %v3432_v41 = vld [vmem:[%s4061_s30 + $0x308] sm:$0xf0]  ;;  %v3062_v43 = vor.u32 %v3392_v39, %v3061_v38  ;;  %v3347_v46 = vld [vmem:[%s4061_s30 + $0x60] sm:$0xf0] }
  0x3c   : > { %1241 = vmatpush.bf16.msra.mxu0 %v2942_v24  ;;  %3458 = vmatpush.bf16.msra.mxu3 %v2942_v24  ;;  %v3222_v44 = vor.u32 %v3432_v41, %v3221_v40  ;;  %v3041_v47 = vld [vmem:[%s4061_s30 + $0x190] sm:$0xf]  ;;  %v3387_v48 = vld [vmem:[%s4061_s30 + $0x1a0] sm:$0xf0]  ;;  %v2882_v51 = vor.u32 %v3347_v46, %v2881_v45  ;;  %v2861_v54 = vld [vmem:[%s4061_s30 + $0x28] sm:$0xf] }
  0x3d   : > { %1270 = vmatpush.bf16.msra.mxu1 %v3102_v25  ;;  %v3201_v49 = vld [vmem:[%s4061_s30 + $0x2d0] sm:$0xf]  ;;  %v3427_v50 = vld [vmem:[%s4061_s30 + $0x2e0] sm:$0xf0]  ;;  %v3042_v52 = vor.u32 %v3387_v48, %v3041_v47  ;;  %v3342_v55 = vld [vmem:[%s4061_s30 + $0x38] sm:$0xf0] }
  0x3e   : > { %1299 = vmatpush.bf16.msra.mxu2 %v3262_v26  ;;  %v3202_v53 = vor.u32 %v3427_v50, %v3201_v49  ;;  %v3021_v56 = vld [vmem:[%s4061_s30 + $0x168] sm:$0xf]  ;;  %v3382_v57 = vld [vmem:[%s4061_s30 + $0x178] sm:$0xf0]  ;;  %v2862_v60 = vor.u32 %v3342_v55, %v2861_v54  ;;  %v2841_v61 = vld [vmem:[%s4061_s30] sm:$0xf] }
  0x3f   : > { %v3181_v58 = vld [vmem:[%s4061_s30 + $0x2a8] sm:$0xf]  ;;  %v3422_v59 = vld [vmem:[%s4061_s30 + $0x2b8] sm:$0xf0]  ;;  %v3337_v62 = vld [vmem:[%s4061_s30 + $0x10] sm:$0xf0]  ;;  %v3022_v0 = vor.u32 %v3382_v57, %v3021_v56 }
  0x40   : > { %1242 = vmatpush.bf16.msra.mxu0 %v2922_v33  ;;  %3459 = vmatpush.bf16.msra.mxu3 %v2922_v33  ;;  %v3001_v63 = vld [vmem:[%s4061_s30 + $0x140] sm:$0xf]  ;;  %v3182_v1 = vor.u32 %v3422_v59, %v3181_v58  ;;  %v3377_v2 = vld [vmem:[%s4061_s30 + $0x150] sm:$0xf0]  ;;  %v3324_v6 = vld [vmem:[#allocation2 + $0x8] sm:$0xf0]  ;;  %v2842_v13 = vor.u32 %v3337_v62, %v2841_v61 }
  0x41   : > { %1271 = vmatpush.bf16.msra.mxu1 %v3082_v34  ;;  %v3161_v3 = vld [vmem:[%s4061_s30 + $0x280] sm:$0xf]  ;;  %v3417_v4 = vld [vmem:[%s4061_s30 + $0x290] sm:$0xf0]  ;;  %v2817_v7 = vld [vmem:[#allocation2 + $0x30] sm:$0xf]  ;;  %v3002_v17 = vor.u32 %v3377_v2, %v3001_v63 }
  0x42   : > { %1300 = vmatpush.bf16.msra.mxu2 %v3242_v35  ;;  %v2793_v5 = vld [vmem:[#allocation2] sm:$0xf]  ;;  %v3330_v8 = vld [vmem:[#allocation2 + $0x38] sm:$0xf0]  ;;  %v2983_v10 = vld [vmem:[%s4061_s30 + $0x12c] sm:$0xf0]  ;;  %v3162_v18 = vor.u32 %v3417_v4, %v3161_v3 }
  0x43   : > { %v3370_v9 = vld [vmem:[%s4061_s30 + $0x11c] sm:$0xf]  ;;  %v2989_v11 = vld [vmem:[%s4061_s30 + $0x120] sm:$0xf]  ;;  %v3373_v12 = vld [vmem:[%s4061_s30 + $0x130] sm:$0xf0]  ;;  %v4124_v27 = vor.u32 %v3324_v6, %v2793_v5  ;;  %v4126_v28 = vor.u32 %v3330_v8, %v2817_v7 }
  0x44   : > { %1243 = vmatpush.bf16.msra.mxu0 %v2902_v42  ;;  %3460 = vmatpush.bf16.msra.mxu3 %v2902_v42  ;;  %v3323_v14 = vld [vmem:[#allocation2 + $0x4] sm:$0xf]  ;;  %v2795_v15 = vld [vmem:[#allocation2 + $0xc] sm:$0xf0]  ;;  %v2801_v16 = vld [vmem:[#allocation2 + $0x8] sm:$0xf]  ;;  %v2986_v22 = vor.u32 %v3370_v9, %v2983_v10  ;;  %v2990_v23 = vor.u32 %v3373_v12, %v2989_v11 }
  0x45   : > { %1272 = vmatpush.bf16.msra.mxu1 %v3062_v43  ;;  %v3325_v19 = vld [vmem:[#allocation2 + $0x10] sm:$0xf0]  ;;  %v3410_v20 = vld [vmem:[%s4061_s30 + $0x25c] sm:$0xf]  ;;  %v3143_v21 = vld [vmem:[%s4061_s30 + $0x26c] sm:$0xf0]  ;;  %v4131_v32 = vor.u32 %v3323_v14, %v2795_v15 }
  0x46   : > { %1301 = vmatpush.bf16.msra.mxu2 %v3222_v44  ;;  %v3365_v24 = vld [vmem:[%s4061_s30 + $0xf4] sm:$0xf]  ;;  %v3450_v25 = vld [vmem:[%s4061_s30 + $0x39c] sm:$0xf]  ;;  %v3303_v26 = vld [vmem:[%s4061_s30 + $0x3ac] sm:$0xf0]  ;;  %v4133_v33 = vor.u32 %v3325_v19, %v2801_v16  ;;  %v3146_v34 = vor.u32 %v3410_v20, %v3143_v21 }
  0x47   : > { %v2963_v29 = vld [vmem:[%s4061_s30 + $0x104] sm:$0xf0]  ;;  %v2969_v30 = vld [vmem:[%s4061_s30 + $0xf8] sm:$0xf]  ;;  %v3368_v31 = vld [vmem:[%s4061_s30 + $0x108] sm:$0xf0]  ;;  %v3306_v35 = vor.u32 %v3450_v25, %v3303_v26 }
  0x48   : > { %1244 = vmatpush.bf16.msra.mxu0 %v2882_v51  ;;  %3461 = vmatpush.bf16.msra.mxu3 %v2882_v51  ;;  %v3405_v36 = vld [vmem:[%s4061_s30 + $0x234] sm:$0xf]  ;;  %v3123_v37 = vld [vmem:[%s4061_s30 + $0x244] sm:$0xf0]  ;;  %v2966_v38 = vor.u32 %v3365_v24, %v2963_v29  ;;  %v3360_v39 = vld [vmem:[%s4061_s30 + $0xcc] sm:$0xf]  ;;  %v2970_v40 = vor.u32 %v3368_v31, %v2969_v30 }
  0x49   : > { %1273 = vmatpush.bf16.msra.mxu1 %v3042_v52  ;;  %v3445_v41 = vld [vmem:[%s4061_s30 + $0x374] sm:$0xf]  ;;  %v3283_v42 = vld [vmem:[%s4061_s30 + $0x384] sm:$0xf0]  ;;  %v2943_v43 = vld [vmem:[%s4061_s30 + $0xdc] sm:$0xf0]  ;;  %v3126_v46 = vor.u32 %v3405_v36, %v3123_v37 }
  0x4a   : > { %1302 = vmatpush.bf16.msra.mxu2 %v3202_v53  ;;  %v2949_v44 = vld [vmem:[%s4061_s30 + $0xd0] sm:$0xf]  ;;  %v3363_v45 = vld [vmem:[%s4061_s30 + $0xe0] sm:$0xf0]  ;;  %v3400_v47 = vld [vmem:[%s4061_s30 + $0x20c] sm:$0xf]  ;;  %v3286_v49 = vor.u32 %v3445_v41, %v3283_v42  ;;  %v2946_v50 = vor.u32 %v3360_v39, %v2943_v43 }
  0x4b   : > { %v3103_v48 = vld [vmem:[%s4061_s30 + $0x21c] sm:$0xf0]  ;;  %v3355_v51 = vld [vmem:[%s4061_s30 + $0xa4] sm:$0xf]  ;;  %v2950_v52 = vor.u32 %v3363_v45, %v2949_v44  ;;  %v3440_v53 = vld [vmem:[%s4061_s30 + $0x34c] sm:$0xf] }
  0x4c   : > { %1245 = vmatpush.bf16.msra.mxu0 %v2862_v60  ;;  %3462 = vmatpush.bf16.msra.mxu3 %v2862_v60  ;;  %v3263_v54 = vld [vmem:[%s4061_s30 + $0x35c] sm:$0xf0]  ;;  %v2923_v55 = vld [vmem:[%s4061_s30 + $0xb4] sm:$0xf0]  ;;  %v2929_v56 = vld [vmem:[%s4061_s30 + $0xa8] sm:$0xf]  ;;  %v3106_v58 = vor.u32 %v3400_v47, %v3103_v48 }
  0x4d   : > { %1274 = vmatpush.bf16.msra.mxu1 %v3022_v0  ;;  %v3358_v57 = vld [vmem:[%s4061_s30 + $0xb8] sm:$0xf0]  ;;  %v3395_v59 = vld [vmem:[%s4061_s30 + $0x1e4] sm:$0xf]  ;;  %v3083_v60 = vld [vmem:[%s4061_s30 + $0x1f4] sm:$0xf0]  ;;  %v3266_v61 = vor.u32 %v3440_v53, %v3263_v54  ;;  %v2926_v62 = vor.u32 %v3355_v51, %v2923_v55 }
  0x4e   : > { %1303 = vmatpush.bf16.msra.mxu2 %v3182_v1  ;;  %v2805_v63 = vld [vmem:[#allocation2 + $0x18] sm:$0xf]  ;;  %v3327_v0 = vld [vmem:[#allocation2 + $0x20] sm:$0xf0]  ;;  %v2829_v1 = vld [vmem:[#allocation2 + $0x48] sm:$0xf]  ;;  %v2930_v4 = vor.u32 %v3358_v57, %v2929_v56 }
  0x4f   : > { %v3333_v2 = vld [vmem:[#allocation2 + $0x50] sm:$0xf0]  ;;  %v3350_v3 = vld [vmem:[%s4061_s30 + $0x7c] sm:$0xf]  ;;  %v3435_v5 = vld [vmem:[%s4061_s30 + $0x324] sm:$0xf] }
  0x50   : > { %1246 = vmatpush.bf16.msra.mxu0 %v2842_v13  ;;  %3463 = vmatpush.bf16.msra.mxu3 %v2842_v13  ;;  %v3243_v6 = vld [vmem:[%s4061_s30 + $0x334] sm:$0xf0]  ;;  %v2903_v7 = vld [vmem:[%s4061_s30 + $0x8c] sm:$0xf0]  ;;  %v2909_v8 = vld [vmem:[%s4061_s30 + $0x80] sm:$0xf]  ;;  %v3086_v13 = vor.u32 %v3395_v59, %v3083_v60  ;;  %v4170_v24 = vor.u32 %v3333_v2, %v2829_v1 }
  0x51   : > { %1275 = vmatpush.bf16.msra.mxu1 %v3002_v17  ;;  %v3353_v9 = vld [vmem:[%s4061_s30 + $0x90] sm:$0xf0]  ;;  %v3326_v10 = vld [vmem:[#allocation2 + $0x1c] sm:$0xf]  ;;  %v2807_v11 = vld [vmem:[#allocation2 + $0x24] sm:$0xf0]  ;;  %v3246_v17 = vor.u32 %v3435_v5, %v3243_v6 }
  0x52   : > { %1304 = vmatpush.bf16.msra.mxu2 %v3162_v18  ;;  %v2813_v12 = vld [vmem:[#allocation2 + $0x20] sm:$0xf]  ;;  %v3328_v14 = vld [vmem:[#allocation2 + $0x28] sm:$0xf0]  ;;  %v3390_v15 = vld [vmem:[%s4061_s30 + $0x1bc] sm:$0xf]  ;;  %v2906_v18 = vor.u32 %v3350_v3, %v2903_v7  ;;  %v2910_v20 = vor.u32 %v3353_v9, %v2909_v8  ;;  %v4175_v30 = vor.u32 %v3326_v10, %v2807_v11 }
  0x53   : > { %1247 = vmatmul.bf16.vlgmr.msra.gmra.mxu0 %v4124_v27  ;;  %1257 = vmatmul.bf16.vlgmr.msra.gmra.mxu3 %v4126_v28  ;;  %v3063_v16 = vld [vmem:[%s4061_s30 + $0x1cc] sm:$0xf0]  ;;  %v3345_v19 = vld [vmem:[%s4061_s30 + $0x54] sm:$0xf]  ;;  %v3430_v21 = vld [vmem:[%s4061_s30 + $0x2fc] sm:$0xf]  ;;  %v4177_v31 = vor.u32 %v3328_v14, %v2813_v12 }
  0x54   : > { %1326 = vmatpush.bf16.msrb.mxu3 %v2986_v22  ;;  %1276 = vmatmul.bf16.vlgmr.msra.gmra.mxu1 %v4131_v32  ;;  %v3223_v22 = vld [vmem:[%s4061_s30 + $0x30c] sm:$0xf0]  ;;  %v2883_v25 = vld [vmem:[%s4061_s30 + $0x64] sm:$0xf0]  ;;  %v2889_v26 = vld [vmem:[%s4061_s30 + $0x58] sm:$0xf] }
  0x55   : > { %1305 = vmatmul.bf16.vlgmr.msra.gmra.mxu2 %v4133_v33  ;;  %1355 = vmatpush.bf16.msrb.mxu0 %v3146_v34  ;;  %v3348_v29 = vld [vmem:[%s4061_s30 + $0x68] sm:$0xf0]  ;;  %v3066_v34 = vor.u32 %v3390_v15, %v3063_v16  ;;  %v3226_v36 = vor.u32 %v3430_v21, %v3223_v22  ;;  %v2886_v37 = vor.u32 %v3345_v19, %v2883_v25  ;;  %v3203_v41 = vld [vmem:[%s4061_s30 + $0x2e4] sm:$0xf0]  ;;  %v2863_v43 = vld [vmem:[%s4061_s30 + $0x3c] sm:$0xf0] }
  0x56   : > { %1413 = vmatpush.bf16.msrb.mxu2 %v2990_v23  ;;  %1384 = vmatpush.bf16.msrb.mxu1 %v3306_v35  ;;  %v4168_v23 = vor.u32 %v3327_v0, %v2805_v63  ;;  %v3385_v35 = vld [vmem:[%s4061_s30 + $0x194] sm:$0xf]  ;;  %v2890_v39 = vor.u32 %v3348_v29, %v2889_v26  ;;  %v3340_v42 = vld [vmem:[%s4061_s30 + $0x2c] sm:$0xf]  ;;  %v2869_v47 = vld [vmem:[%s4061_s30 + $0x30] sm:$0xf] }
  0x57   : > { %v3380_v45 = vld [vmem:[%s4061_s30 + $0x16c] sm:$0xf]  ;;  %v3343_v48 = vld [vmem:[%s4061_s30 + $0x40] sm:$0xf0]  ;;  %v3183_v53 = vld [vmem:[%s4061_s30 + $0x2bc] sm:$0xf0] }
  0x58   : > { %1327 = vmatpush.bf16.msrb.mxu3 %v2966_v38  ;;  %v3043_v38 = vld [vmem:[%s4061_s30 + $0x1a4] sm:$0xf0]  ;;  %v2870_v51 = vor.u32 %v3343_v48, %v2869_v47  ;;  %v3335_v54 = vld [vmem:[%s4061_s30 + $0x4] sm:$0xf]  ;;  %v2843_v55 = vld [vmem:[%s4061_s30 + $0x14] sm:$0xf0] }
  0x59   : > { %1356 = vmatpush.bf16.msrb.mxu0 %v3126_v46  ;;  %v3046_v44 = vor.u32 %v3385_v35, %v3043_v38  ;;  %v2849_v56 = vld [vmem:[%s4061_s30 + $0x8] sm:$0xf]  ;;  %v3149_v57 = vld [vmem:[%s4061_s30 + $0x260] sm:$0xf]  ;;  %v3338_v59 = vld [vmem:[%s4061_s30 + $0x18] sm:$0xf0]  ;;  %v2846_v63 = vor.u32 %v3335_v54, %v2843_v55 }
  0x5a   : > { %1414 = vmatpush.bf16.msrb.mxu2 %v2970_v40  ;;  %1385 = vmatpush.bf16.msrb.mxu1 %v3286_v49  ;;  %v3425_v40 = vld [vmem:[%s4061_s30 + $0x2d4] sm:$0xf]  ;;  %v2866_v49 = vor.u32 %v3340_v42, %v2863_v43  ;;  %v3003_v0 = vld [vmem:[%s4061_s30 + $0x154] sm:$0xf0]  ;;  %v2850_v1 = vor.u32 %v3338_v59, %v2849_v56  ;;  %v3415_v2 = vld [vmem:[%s4061_s30 + $0x284] sm:$0xf] }
  0x5b   : > { %v3206_v46 = vor.u32 %v3425_v40, %v3203_v41  ;;  %v3163_v3 = vld [vmem:[%s4061_s30 + $0x294] sm:$0xf0]  ;;  %v3309_v5 = vld [vmem:[%s4061_s30 + $0x3a0] sm:$0xf]  ;;  %v3453_v6 = vld [vmem:[%s4061_s30 + $0x3b0] sm:$0xf0] }
  0x5c   : > { %1328 = vmatpush.bf16.msrb.mxu3 %v2946_v50  ;;  %v3023_v50 = vld [vmem:[%s4061_s30 + $0x17c] sm:$0xf0]  ;;  %v3329_v7 = vld [vmem:[#allocation2 + $0x34] sm:$0xf]  ;;  %v2825_v10 = vld [vmem:[#allocation2 + $0x38] sm:$0xf]  ;;  %v3166_v12 = vor.u32 %v3415_v2, %v3163_v3 }
  0x5d   : > { %1357 = vmatpush.bf16.msrb.mxu0 %v3106_v58  ;;  %v3413_v58 = vld [vmem:[%s4061_s30 + $0x270] sm:$0xf0]  ;;  %v3026_v60 = vor.u32 %v3380_v45, %v3023_v50  ;;  %v2819_v9 = vld [vmem:[#allocation2 + $0x3c] sm:$0xf0]  ;;  %v3331_v11 = vld [vmem:[#allocation2 + $0x40] sm:$0xf0] }
  0x5e   : > { %1415 = vmatpush.bf16.msrb.mxu2 %v2950_v52  ;;  %1386 = vmatpush.bf16.msrb.mxu1 %v3266_v61  ;;  %v3420_v52 = vld [vmem:[%s4061_s30 + $0x2ac] sm:$0xf]  ;;  %v3375_v61 = vld [vmem:[%s4061_s30 + $0x144] sm:$0xf]  ;;  %v3129_v14 = vld [vmem:[%s4061_s30 + $0x238] sm:$0xf]  ;;  %v4213_v19 = vor.u32 %v3331_v11, %v2825_v10 }
  0x5f   : > { %v3006_v8 = vor.u32 %v3375_v61, %v3003_v0  ;;  %v3408_v15 = vld [vmem:[%s4061_s30 + $0x248] sm:$0xf0]  ;;  %v3289_v16 = vld [vmem:[%s4061_s30 + $0x378] sm:$0xf]  ;;  %v3109_v22 = vld [vmem:[%s4061_s30 + $0x210] sm:$0xf] }
  0x60   : > { %1329 = vmatpush.bf16.msrb.mxu3 %v2926_v62  ;;  %v3186_v62 = vor.u32 %v3420_v52, %v3183_v53  ;;  %v3403_v25 = vld [vmem:[%s4061_s30 + $0x220] sm:$0xf0]  ;;  %v3269_v26 = vld [vmem:[%s4061_s30 + $0x350] sm:$0xf]  ;;  %v3089_v35 = vld [vmem:[%s4061_s30 + $0x1e8] sm:$0xf] }
  0x61   : > { %1358 = vmatpush.bf16.msrb.mxu0 %v3086_v13  ;;  %v3310_v13 = vor.u32 %v3453_v6, %v3309_v5  ;;  %v3443_v29 = vld [vmem:[%s4061_s30 + $0x360] sm:$0xf0]  ;;  %v3398_v38 = vld [vmem:[%s4061_s30 + $0x1f8] sm:$0xf0]  ;;  %v3151_v40 = vld [vmem:[%s4061_s30 + $0x274] sm:$0xf0] }
  0x62   : > { %1416 = vmatpush.bf16.msrb.mxu2 %v2930_v4  ;;  %1387 = vmatpush.bf16.msrb.mxu1 %v3246_v17  ;;  %v3150_v4 = vor.u32 %v3413_v58, %v3149_v57  ;;  %v3448_v17 = vld [vmem:[%s4061_s30 + $0x388] sm:$0xf0]  ;;  %v3438_v41 = vld [vmem:[%s4061_s30 + $0x338] sm:$0xf0]  ;;  %v3371_v43 = vld [vmem:[%s4061_s30 + $0x124] sm:$0xf]  ;;  %v3090_v48 = vor.u32 %v3398_v38, %v3089_v35 }
  0x63   : > { %1252 = vmatmul.bf16.gmra.mxu0 %v4168_v23  ;;  %1262 = vmatmul.bf16.gmra.mxu3 %v4170_v24  ;;  %v3290_v21 = vor.u32 %v3448_v17, %v3289_v16  ;;  %v3131_v47 = vld [vmem:[%s4061_s30 + $0x24c] sm:$0xf0]  ;;  %v3366_v50 = vld [vmem:[%s4061_s30 + $0xfc] sm:$0xf]  ;;  %v3069_v52 = vld [vmem:[%s4061_s30 + $0x1c0] sm:$0xf] }
  0x64   : > { %1330 = vmatpush.bf16.msrb.mxu3 %v2906_v18  ;;  %1281 = vmatmul.bf16.gmra.mxu1 %v4175_v30  ;;  %v4211_v18 = vor.u32 %v3329_v7, %v2819_v9  ;;  %v3393_v53 = vld [vmem:[%s4061_s30 + $0x1d0] sm:$0xf0]  ;;  %v2971_v54 = vld [vmem:[%s4061_s30 + $0x10c] sm:$0xf0]  ;;  %v3229_v55 = vld [vmem:[%s4061_s30 + $0x300] sm:$0xf] }
  0x65   : > { %1310 = vmatmul.bf16.gmra.mxu2 %v4177_v31  ;;  %1359 = vmatpush.bf16.msrb.mxu0 %v3066_v34  ;;  %v3110_v34 = vor.u32 %v3403_v25, %v3109_v22  ;;  %v3433_v56 = vld [vmem:[%s4061_s30 + $0x310] sm:$0xf0]  ;;  %v2974_v57 = vor.u32 %v3366_v50, %v2971_v54  ;;  %v3332_v58 = vld [vmem:[#allocation2 + $0x4c] sm:$0xf]  ;;  %v2831_v59 = vld [vmem:[#allocation2 + $0x54] sm:$0xf0] }
  0x66   : > { %1417 = vmatpush.bf16.msrb.mxu2 %v2910_v20  ;;  %1388 = vmatpush.bf16.msrb.mxu1 %v3226_v36  ;;  %v3130_v20 = vor.u32 %v3408_v15, %v3129_v14  ;;  %v3411_v36 = vld [vmem:[%s4061_s30 + $0x264] sm:$0xf]  ;;  %v3334_v61 = vld [vmem:[#allocation2 + $0x58] sm:$0xf0]  ;;  %v3049_v0 = vld [vmem:[%s4061_s30 + $0x198] sm:$0xf] }
  0x67   : > { %v3154_v42 = vor.u32 %v3411_v36, %v3151_v40  ;;  %v3209_v2 = vld [vmem:[%s4061_s30 + $0x2d8] sm:$0xf]  ;;  %v3428_v3 = vld [vmem:[%s4061_s30 + $0x2e8] sm:$0xf0]  ;;  %v3383_v9 = vld [vmem:[%s4061_s30 + $0x180] sm:$0xf0] }
  0x68   : > { %1331 = vmatpush.bf16.msrb.mxu3 %v2886_v37  ;;  %v3270_v37 = vor.u32 %v3443_v29, %v3269_v26  ;;  %v3210_v7 = vor.u32 %v3428_v3, %v3209_v2  ;;  %v3401_v10 = vld [vmem:[%s4061_s30 + $0x214] sm:$0xf]  ;;  %v3423_v14 = vld [vmem:[%s4061_s30 + $0x2c0] sm:$0xf0]  ;;  %v3378_v25 = vld [vmem:[%s4061_s30 + $0x158] sm:$0xf0] }
  0x69   : > { %1360 = vmatpush.bf16.msrb.mxu0 %v3046_v44  ;;  %v2991_v44 = vld [vmem:[%s4061_s30 + $0x134] sm:$0xf0]  ;;  %v3361_v17 = vld [vmem:[%s4061_s30 + $0xd4] sm:$0xf]  ;;  %v3396_v26 = vld [vmem:[%s4061_s30 + $0x1ec] sm:$0xf] }
  0x6a   : > { %1418 = vmatpush.bf16.msrb.mxu2 %v2890_v39  ;;  %1389 = vmatpush.bf16.msrb.mxu1 %v3206_v46  ;;  %v3249_v39 = vld [vmem:[%s4061_s30 + $0x328] sm:$0xf]  ;;  %v2994_v45 = vor.u32 %v3371_v43, %v2991_v44  ;;  %v3406_v46 = vld [vmem:[%s4061_s30 + $0x23c] sm:$0xf]  ;;  %v3091_v29 = vld [vmem:[%s4061_s30 + $0x1fc] sm:$0xf0] }
  0x6b   : > { %v3094_v35 = vor.u32 %v3396_v26, %v3091_v29  ;;  %v3169_v36 = vld [vmem:[%s4061_s30 + $0x288] sm:$0xf]  ;;  %v3356_v38 = vld [vmem:[%s4061_s30 + $0xac] sm:$0xf]  ;;  %v2931_v40 = vld [vmem:[%s4061_s30 + $0xbc] sm:$0xf0] }
  0x6c   : > { %1332 = vmatpush.bf16.msrb.mxu3 %v2866_v49  ;;  %v3134_v49 = vor.u32 %v3406_v46, %v3131_v47  ;;  %v3071_v43 = vld [vmem:[%s4061_s30 + $0x1d4] sm:$0xf0]  ;;  %v3451_v44 = vld [vmem:[%s4061_s30 + $0x3a4] sm:$0xf]  ;;  %v3381_v2 = vld [vmem:[%s4061_s30 + $0x174] sm:$0xf] }
  0x6d   : > { %1361 = vmatpush.bf16.msrb.mxu0 %v3026_v60  ;;  %v2837_v60 = vld [vmem:[#allocation2 + $0x50] sm:$0xf]  ;;  %v3311_v46 = vld [vmem:[%s4061_s30 + $0x3b4] sm:$0xf0]  ;;  %v3351_v47 = vld [vmem:[%s4061_s30 + $0x84] sm:$0xf] }
  0x6e   : > { %1419 = vmatpush.bf16.msrb.mxu2 %v2870_v51  ;;  %1390 = vmatpush.bf16.msrb.mxu1 %v3186_v62  ;;  %v3250_v51 = vor.u32 %v3438_v41, %v3249_v39  ;;  %v3070_v62 = vor.u32 %v3393_v53, %v3069_v52  ;;  %v4245_v5 = vor.u32 %v3334_v61, %v2837_v60  ;;  %v3374_v52 = vld [vmem:[%s4061_s30 + $0x138] sm:$0xf0]  ;;  %v2891_v61 = vld [vmem:[%s4061_s30 + $0x6c] sm:$0xf0]  ;;  %v3031_v3 = vld [vmem:[%s4061_s30 + $0x184] sm:$0xf0] }
  0x6f   : > { %v2934_v41 = vor.u32 %v3356_v38, %v2931_v40  ;;  %v3386_v53 = vld [vmem:[%s4061_s30 + $0x19c] sm:$0xf]  ;;  %v3336_v26 = vld [vmem:[%s4061_s30 + $0xc] sm:$0xf]  ;;  %v2851_v29 = vld [vmem:[%s4061_s30 + $0x1c] sm:$0xf0] }
  0x70   : > { %1333 = vmatpush.bf16.msrb.mxu3 %v2846_v63  ;;  %v3230_v63 = vor.u32 %v3433_v56, %v3229_v55  ;;  %v3051_v55 = vld [vmem:[%s4061_s30 + $0x1ac] sm:$0xf0]  ;;  %v3446_v56 = vld [vmem:[%s4061_s30 + $0x37c] sm:$0xf]  ;;  %v3431_v38 = vld [vmem:[%s4061_s30 + $0x304] sm:$0xf] }
  0x71   : > { %1362 = vmatpush.bf16.msrb.mxu0 %v3006_v8  ;;  %v3029_v8 = vld [vmem:[%s4061_s30 + $0x170] sm:$0xf]  ;;  %v3346_v60 = vld [vmem:[%s4061_s30 + $0x5c] sm:$0xf]  ;;  %v3317_v40 = vld [vmem:[%s4061_s30 + $0x3a8] sm:$0xf] }
  0x72   : > { %1420 = vmatpush.bf16.msrb.mxu2 %v2850_v1  ;;  %1391 = vmatpush.bf16.msrb.mxu1 %v3166_v12  ;;  %v3388_v1 = vld [vmem:[%s4061_s30 + $0x1a8] sm:$0xf0]  ;;  %v3030_v11 = vor.u32 %v3383_v9, %v3029_v8  ;;  %v3111_v12 = vld [vmem:[%s4061_s30 + $0x224] sm:$0xf0]  ;;  %v3341_v9 = vld [vmem:[%s4061_s30 + $0x34] sm:$0xf] }
  0x73   : > { %1334 = vmatmul.bf16.vlgmr.msrb.gmra.mxu3 %v4124_v27  ;;  %v3050_v6 = vor.u32 %v3388_v1, %v3049_v0  ;;  %v3114_v15 = vor.u32 %v3401_v10, %v3111_v12  ;;  %v3369_v0 = vld [vmem:[%s4061_s30 + $0x110] sm:$0xf0]  ;;  %v3271_v8 = vld [vmem:[%s4061_s30 + $0x364] sm:$0xf0]  ;;  %s4335_s6 = scalar_lea.vmem [#allocation7], %s3483_s1  ;;  %s3484_s10 = smul.u32 320, %s4058_s26 }
  0x74   : > { %1442 = vmatpush.bf16.msra.mxu3 %v3150_v4  ;;  %1286 = vmatmul.bf16.gmra.mxu1 %v4211_v18  ;;  %v4243_v4 = vor.u32 %v3332_v58, %v2831_v59  ;;  %v3054_v58 = vor.u32 %v3386_v53, %v3051_v55  ;;  %v2871_v10 = vld [vmem:[%s4061_s30 + $0x44] sm:$0xf0]  ;;  %v3421_v53 = vld [vmem:[%s4061_s30 + $0x2b4] sm:$0xf]  ;;  %v2877_v55 = vld [vmem:[%s4061_s30 + $0x38] sm:$0xf] }
  0x75   : > { %1471 = vmatpush.bf16.msra.mxu0 %v3310_v13  ;;  %1315 = vmatmul.bf16.gmra.mxu2 %v4213_v19  ;;  %v3189_v13 = vld [vmem:[%s4061_s30 + $0x2b0] sm:$0xf]  ;;  %v2874_v12 = vor.u32 %v3341_v9, %v2871_v10  ;;  %s4435_s19 = scalar_lea.vmem [#allocation8], %s3484_s10  ;;  %s3455_s27 = smul.u32 40, %s3900_s15 }
  0x76   : > { %1363 = vmatmul.bf16.vlgmr.msrb.gmra.mxu0 %v4131_v32  ;;  %1529 = vmatpush.bf16.msra.mxu2 %v3154_v42  ;;  %v3190_v16 = vor.u32 %v3423_v14, %v3189_v13  ;;  %v3391_v42 = vld [vmem:[%s4061_s30 + $0x1c4] sm:$0xf]  ;;  %v2957_v13 = vld [vmem:[%s4061_s30 + $0xd8] sm:$0xf]  ;;  %v3364_v14 = vld [vmem:[%s4061_s30 + $0xe8] sm:$0xf0] }
  0x77   : > { %1500 = vmatpush.bf16.msra.mxu1 %v2994_v45  ;;  %v3074_v45 = vor.u32 %v3391_v42, %v3071_v43  ;;  %v3454_v42 = vld [vmem:[%s4061_s30 + $0x3b8] sm:$0xf0]  ;;  %s2652_s5 = scalar_lea.hbm %s5223_s3, %s3455_s27  ;;  %s2653_s15 = sshll.u32 %s4435_s19, 4  ;;  %s2654_s15 = int_to_ptr.vmem [resolvable:$true] %s2653_s15 }
  0x78   : > { %1443 = vmatpush.bf16.msra.mxu3 %v3130_v20  ;;  %v2951_v20 = vld [vmem:[%s4061_s30 + $0xe4] sm:$0xf0]  ;;  %v3318_v43 = vor.u32 %v3454_v42, %v3317_v40  ;;  %s2655_s7 = sshll.u32 %s2652_s5, 4  ;;  %s2638_s8 = scalar_lea.sflag [#allocation4], %s4058_s26  ;;  %s2656_s7 = int_to_ptr.hbm [resolvable:$true] %s2655_s7 }
  0x79   : > { %1472 = vmatpush.bf16.msra.mxu0 %v3290_v21  ;;  %v3009_v21 = vld [vmem:[%s4061_s30 + $0x148] sm:$0xf]  ;;  %v2954_v22 = vor.u32 %v3361_v17, %v2951_v20  ;;  %v3011_v17 = vld [vmem:[%s4061_s30 + $0x15c] sm:$0xf0]  ;;  %v3436_v20 = vld [vmem:[%s4061_s30 + $0x32c] sm:$0xf] }
  0x7a   : > { %1530 = vmatpush.bf16.msra.mxu2 %v3134_v49  ;;  %v3314_v49 = vor.u32 %v3451_v44, %v3311_v46  ;;  %v2917_v44 = vld [vmem:[%s4061_s30 + $0x88] sm:$0xf]  ;;  %s3836_s9 = sshra.s32 %s2656_s7, 4  ;;  %s3842_s22 = scalar_lea.hbm %s5223_s3, 640  ;;  %s3837_s9 = int_to_ptr.hbm [resolvable:$true] %s3836_s9 }
  0x7b   : > { %1501 = vmatpush.bf16.msra.mxu1 %v2974_v57  ;;  %v3291_v57 = vld [vmem:[%s4061_s30 + $0x38c] sm:$0xf0]  ;;  %s3838_s11 = scalar_lea.hbm %s3837_s9, 320  ;;  %p3843_p10 = scmp.lt.s32.totalorder %s3837_s9, %s5223_s3 }
  0x7c   : > { %1444 = vmatpush.bf16.msra.mxu3 %v3110_v34  ;;  %v3010_v34 = vor.u32 %v3378_v25, %v3009_v21  ;;  %v3294_v59 = vor.u32 %v3446_v56, %v3291_v57  ;;  %v3251_v21 = vld [vmem:[%s4061_s30 + $0x33c] sm:$0xf0]  ;;  %v3344_v57 = vld [vmem:[%s4061_s30 + $0x48] sm:$0xf0]  ;;  %p3839_p7 = scmp.ne.s32.totalorder %s3837_s9, %s3838_s11  ;;  %p3844_p11 = scmp.lt.s32.totalorder %s3842_s22, %s3838_s11 }
  0x7d   : > { %1473 = vmatpush.bf16.msra.mxu0 %v3270_v37  ;;  %v3418_v37 = vld [vmem:[%s4061_s30 + $0x298] sm:$0xf0]  ;;  %v3254_v25 = vor.u32 %v3436_v20, %v3251_v21  ;;  %v3409_v21 = vld [vmem:[%s4061_s30 + $0x250] sm:$0xf0] }
  0x7e   : > { %1531 = vmatpush.bf16.msra.mxu2 %v3114_v15  ;;  %v3170_v39 = vor.u32 %v3418_v37, %v3169_v36  ;;  %v3376_v15 = vld [vmem:[%s4061_s30 + $0x14c] sm:$0xf]  ;;  %v3359_v36 = vld [vmem:[%s4061_s30 + $0xc0] sm:$0xf0]  ;;  %p3840_p8 = pnand %p3839_p7, %p4021_p0  ;;  %p3845_p12 = por %p3844_p11, %p3843_p10 }
  0x7f   : > { %1502 = vmatpush.bf16.msra.mxu1 %v2954_v22  ;;  %v3014_v22 = vor.u32 %v3376_v15, %v3011_v17  ;;  %v3137_v15 = vld [vmem:[%s4061_s30 + $0x240] sm:$0xf] }
  0x80   : > { %1445 = vmatpush.bf16.msra.mxu3 %v3090_v48  ;;  %v2911_v48 = vld [vmem:[%s4061_s30 + $0x94] sm:$0xf0]  ;;  %p3841_p9 = pneg %p3840_p8 }
  0x81   : > { %1474 = vmatpush.bf16.msra.mxu0 %v3250_v51  ;;  %v2914_v50 = vor.u32 %v3351_v47, %v2911_v48  ;;  %v2997_v51 = vld [vmem:[%s4061_s30 + $0x128] sm:$0xf]  ;;  %v3426_v47 = vld [vmem:[%s4061_s30 + $0x2dc] sm:$0xf]  ;;  %v3211_v48 = vld [vmem:[%s4061_s30 + $0x2ec] sm:$0xf0] }
  0x82   : > { %1532 = vmatpush.bf16.msra.mxu2 %v3094_v35  ;;  %v2998_v54 = vor.u32 %v3374_v52, %v2997_v51  ;;  %v2854_v35 = vor.u32 %v3336_v26, %v2851_v29  ;;  %v3349_v51 = vld [vmem:[%s4061_s30 + $0x70] sm:$0xf0]  ;;  %v3277_v29 = vld [vmem:[%s4061_s30 + $0x358] sm:$0xf]  ;;  %p3846_p13 = pnand %p3845_p12, %p3841_p9 }
  0x83   : > { %1339 = vmatmul.bf16.gmra.mxu3 %v4168_v23  ;;  %1503 = vmatpush.bf16.msra.mxu1 %v2934_v41 }
  0x84   : > { %1446 = vmatpush.bf16.msra.mxu3 %v3070_v62  ;;  %1291 = vmatmul.bf16.gmra.mxu1 %v4243_v4  ;;  %v2977_v62 = vld [vmem:[%s4061_s30 + $0x100] sm:$0xf] }
  0x85   : > { %1475 = vmatpush.bf16.msra.mxu0 %v3230_v63  ;;  %1320 = vmatmul.bf16.gmra.mxu2 %v4245_v5  ;;  %v2894_v63 = vor.u32 %v3346_v60, %v2891_v61  ;;  %v2978_v1 = vor.u32 %v3369_v0, %v2977_v62  ;;  %v3171_v60 = vld [vmem:[%s4061_s30 + $0x29c] sm:$0xf0]  ;;  %v2857_v61 = vld [vmem:[%s4061_s30 + $0x10] sm:$0xf]  ;;  %v3339_v0 = vld [vmem:[%s4061_s30 + $0x20] sm:$0xf0] }
  0x86   : > { %1368 = vmatmul.bf16.gmra.mxu0 %v4175_v30  ;;  %1533 = vmatpush.bf16.msra.mxu2 %v3074_v45  ;;  %v3354_v45 = vld [vmem:[%s4061_s30 + $0x98] sm:$0xf0] }
  0x87   : > { %1504 = vmatpush.bf16.msra.mxu1 %v2914_v50  ;;  %v2918_v46 = vor.u32 %v3354_v45, %v2917_v44  ;;  %v3214_v50 = vor.u32 %v3426_v47, %v3211_v48  ;;  %v3257_v44 = vld [vmem:[%s4061_s30 + $0x330] sm:$0xf]  ;;  %v3439_v45 = vld [vmem:[%s4061_s30 + $0x340] sm:$0xf0] }
  0x88   : > { %1447 = vmatpush.bf16.msra.mxu3 %v3050_v6  ;;  %v3441_v6 = vld [vmem:[%s4061_s30 + $0x354] sm:$0xf] }
  0x89   : > { %1476 = vmatpush.bf16.msra.mxu0 %v3210_v7  ;;  %v3034_v7 = vor.u32 %v3381_v2, %v3031_v3  ;;  %v2858_v2 = vor.u32 %v3339_v0, %v2857_v61  ;;  %v4338_v3 = vld [vmem:[%s4335_s6] sm:$0x1f] }
  0x8a   : > { %1534 = vmatpush.bf16.msra.mxu2 %v3054_v58  ;;  %v2878_v58 = vor.u32 %v3344_v57, %v2877_v55  ;;  %v3434_v55 = vld [vmem:[%s4061_s30 + $0x318] sm:$0xf0] }
  0x8b   : > { %1505 = vmatpush.bf16.msra.mxu1 %v2894_v63 }
  0x8c   : > { %1448 = vmatpush.bf16.msra.mxu3 %v3030_v11  ;;  %v3274_v11 = vor.u32 %v3441_v6, %v3271_v8  ;;  %v3157_v6 = vld [vmem:[%s4061_s30 + $0x268] sm:$0xf] }
  0x8d   : > { %1477 = vmatpush.bf16.msra.mxu0 %v3190_v16  ;;  %v2958_v16 = vor.u32 %v3364_v14, %v2957_v13  ;;  %v3297_v13 = vld [vmem:[%s4061_s30 + $0x380] sm:$0xf]  ;;  %v3449_v14 = vld [vmem:[%s4061_s30 + $0x390] sm:$0xf0] }
  0x8e   : > { %1535 = vmatpush.bf16.msra.mxu2 %v3034_v7  ;;  %v3414_v7 = vld [vmem:[%s4061_s30 + $0x278] sm:$0xf0]  ;;  %v3298_v20 = vor.u32 %v3449_v14, %v3297_v13 }
  0x8f   : > { %1506 = vmatpush.bf16.msra.mxu1 %v2874_v12  ;;  %v3158_v9 = vor.u32 %v3414_v7, %v3157_v6 }
  0x90   : > { %1449 = vmatpush.bf16.msra.mxu3 %v3010_v34  ;;  %v2937_v34 = vld [vmem:[%s4061_s30 + $0xb0] sm:$0xf] }
  0x91   : > { %1478 = vmatpush.bf16.msra.mxu0 %v3170_v39  ;;  %v2938_v37 = vor.u32 %v3359_v36, %v2937_v34  ;;  %v3231_v39 = vld [vmem:[%s4061_s30 + $0x314] sm:$0xf0]  ;;  %v3444_v34 = vld [vmem:[%s4061_s30 + $0x368] sm:$0xf0] }
  0x92   : > { %1536 = vmatpush.bf16.msra.mxu2 %v3014_v22  ;;  %v3234_v41 = vor.u32 %v3431_v38, %v3231_v39  ;;  %v3404_v38 = vld [vmem:[%s4061_s30 + $0x228] sm:$0xf0] }
  0x93   : > { %1344 = vmatmul.bf16.gmra.mxu3 %v4126_v28  ;;  %1507 = vmatpush.bf16.msra.mxu1 %v2854_v35  ;;  %v3117_v35 = vld [vmem:[%s4061_s30 + $0x218] sm:$0xf] }
  0x94   : > { %1392 = vmatmul.bf16.vlgmr.msrb.gmra.mxu1 %v4133_v33  ;;  %1558 = vmatpush.bf16.msrb.mxu3 %v3314_v49  ;;  %v2897_v49 = vld [vmem:[%s4061_s30 + $0x60] sm:$0xf]  ;;  %v3118_v39 = vor.u32 %v3404_v38, %v3117_v35  ;;  %v3424_v35 = vld [vmem:[%s4061_s30 + $0x2c8] sm:$0xf0] }
  0x95   : > { %1421 = vmatmul.bf16.vlgmr.msrb.gmra.mxu2 %v4124_v27  ;;  %1587 = vmatpush.bf16.msrb.mxu0 %v2998_v54  ;;  %v2898_v52 = vor.u32 %v3349_v51, %v2897_v49  ;;  %v3191_v54 = vld [vmem:[%s4061_s30 + $0x2c4] sm:$0xf0]  ;;  %v3258_v49 = vor.u32 %v3439_v45, %v3257_v44 }
  0x96   : > { %1373 = vmatmul.bf16.gmra.mxu0 %v4211_v18  ;;  %1645 = vmatpush.bf16.msrb.mxu2 %v3318_v43  ;;  %v3194_v56 = vor.u32 %v3421_v53, %v3191_v54  ;;  %v3237_v54 = vld [vmem:[%s4061_s30 + $0x308] sm:$0xf] }
  0x97   : > { %3464 = vmatpush.bf16.msrb.mxu1 %v3158_v9 }
  0x98   : > { %1559 = vmatpush.bf16.msrb.mxu3 %v3294_v59  ;;  %v3416_v59 = vld [vmem:[%s4061_s30 + $0x28c] sm:$0xf] }
  0x99   : > { %1588 = vmatpush.bf16.msrb.mxu0 %v2978_v1  ;;  %v3174_v63 = vor.u32 %v3416_v59, %v3171_v60  ;;  %v3077_v59 = vld [vmem:[%s4061_s30 + $0x1c8] sm:$0xf]  ;;  %v3394_v60 = vld [vmem:[%s4061_s30 + $0x1d8] sm:$0xf0] }
  0x9a   : > { %1646 = vmatpush.bf16.msrb.mxu2 %v3298_v20  ;;  %v3078_v61 = vor.u32 %v3394_v60, %v3077_v59 }
  0x9c   : > { %1560 = vmatpush.bf16.msrb.mxu3 %v3274_v11  ;;  %v4348_v11 = vperm.slane %v4338_v3, 0 }
  0x9d   : > { %1589 = vmatpush.bf16.msrb.mxu0 %v2958_v16 }
  0xa0   : > { %1561 = vmatpush.bf16.msrb.mxu3 %v3254_v25  ;;  %v3138_v25 = vor.u32 %v3409_v21, %v3137_v15  ;;  %v3057_v15 = vld [vmem:[%s4061_s30 + $0x1a0] sm:$0xf] }
  0xa1   : > { %1590 = vmatpush.bf16.msrb.mxu0 %v2938_v37  ;;  %v3278_v37 = vor.u32 %v3444_v34, %v3277_v29  ;;  %v3197_v34 = vld [vmem:[%s4061_s30 + $0x2b8] sm:$0xf] }
  0xa2   : > { %3465 = vmatpush.bf16.msrb.mxu1 %v3138_v25 }
  0xa3   : > { %1349 = vmatmul.bf16.gmra.mxu3 %v4170_v24  ;;  %1647 = vmatpush.bf16.msrb.mxu2 %v3278_v37 }
  0xa4   : > { %1397 = vmatmul.bf16.gmra.mxu1 %v4177_v31  ;;  %1562 = vmatpush.bf16.msrb.mxu3 %v3234_v41 }
  0xa5   : > { %1426 = vmatmul.bf16.gmra.mxu2 %v4168_v23  ;;  %1591 = vmatpush.bf16.msrb.mxu0 %v2918_v46  ;;  %v3097_v46 = vld [vmem:[%s4061_s30 + $0x1f0] sm:$0xf] }
  0xa6   : > { %1378 = vmatmul.bf16.gmra.mxu0 %v4243_v4  ;;  %3466 = vmatpush.bf16.msrb.mxu1 %v3118_v39 }
  0xa7   : > { %1648 = vmatpush.bf16.msrb.mxu2 %v3258_v49 }
  0xa8   : > { %1563 = vmatpush.bf16.msrb.mxu3 %v3214_v50  ;;  %v3399_v50 = vld [vmem:[%s4061_s30 + $0x200] sm:$0xf0] }
  0xa9   : > { %1592 = vmatpush.bf16.msrb.mxu0 %v2898_v52  ;;  %v3098_v52 = vor.u32 %v3399_v50, %v3097_v46 }
  0xab   : > { %3467 = vmatpush.bf16.msrb.mxu1 %v3098_v52 }
  0xac   : > { %1564 = vmatpush.bf16.msrb.mxu3 %v3194_v56 }
  0xad   : > { %1593 = vmatpush.bf16.msrb.mxu0 %v2878_v58  ;;  %v3238_v58 = vor.u32 %v3434_v55, %v3237_v54 }
  0xaf   : > { %1649 = vmatpush.bf16.msrb.mxu2 %v3238_v58  ;;  %3468 = vmatpush.bf16.msrb.mxu1 %v3078_v61 }
  0xb0   : > { %1565 = vmatpush.bf16.msrb.mxu3 %v3174_v63 }
  0xb1   : > { %1594 = vmatpush.bf16.msrb.mxu0 %v2858_v2 }
  0xb3   : > { %1450 = vmatmul.bf16.vlgmr.msra.gmra.mxu3 %v4131_v32 }
  0xb4   : > { %1402 = vmatmul.bf16.gmra.mxu1 %v4213_v19  ;;  %3472 = vmatpush.bf16.msra.mxu3 %v3318_v43 }
  0xb5   : > { %1431 = vmatmul.bf16.gmra.mxu2 %v4126_v28 }
  0xb6   : > { %1479 = vmatmul.bf16.vlgmr.msra.gmra.mxu0 %v4133_v33 }
  0xb7   : > { %1616 = vmatpush.bf16.msra.mxu0 %v3158_v9  ;;  %v3429_v9 = vld [vmem:[%s4061_s30 + $0x2f0] sm:$0xf0] }
  0xb8   : > { %3473 = vmatpush.bf16.msra.mxu3 %v3298_v20 }
  0xbb   : > { %1617 = vmatpush.bf16.msra.mxu0 %v3138_v25 }
  0xbc   : > { %3474 = vmatpush.bf16.msra.mxu3 %v3278_v37 }
  0xbf   : > { %1618 = vmatpush.bf16.msra.mxu0 %v3118_v39  ;;  %v3198_v39 = vor.u32 %v3424_v35, %v3197_v34 }
  0xc0   : > { %3475 = vmatpush.bf16.msra.mxu3 %v3258_v49 }
  0xc3   : > { %1455 = vmatmul.bf16.gmra.mxu3 %v4175_v30  ;;  %1619 = vmatpush.bf16.msra.mxu0 %v3098_v52  ;;  %v3419_v52 = vld [vmem:[%s4061_s30 + $0x2a0] sm:$0xf0] }
  0xc4   : > { %1407 = vmatmul.bf16.gmra.mxu1 %v4245_v5  ;;  %3476 = vmatpush.bf16.msra.mxu3 %v3238_v58 }
  0xc5   : > { %1436 = vmatmul.bf16.gmra.mxu2 %v4170_v24 }
  0xc6   : > { %1484 = vmatmul.bf16.gmra.mxu0 %v4177_v31 }
  0xc7   : > { %1620 = vmatpush.bf16.msra.mxu0 %v3078_v61 }
  0xd0   : > { %v1248_v62 = vpop.f32.mrf.mxu0 }
  0xd1   : > { %v1277_v1 = vpop.f32.mrf.mxu1 }
  0xd2   : > { %v1278_v8 = vadd.f32 %v1277_v1, %v1248_v62 }
  0xd3   : > { %1460 = vmatmul.bf16.gmra.mxu3 %v4211_v18 }
  0xd4   : > { %1508 = vmatmul.bf16.vlgmr.msra.gmra.mxu1 %v4124_v27 }
  0xd5   : > { %1537 = vmatmul.bf16.vlgmr.msra.gmra.mxu2 %v4131_v32 }
  0xd6   : > { %1489 = vmatmul.bf16.gmra.mxu0 %v4213_v19  ;;  %v4345_v10 = vpop.f32.mrf.mxu3 }
  0xd8   : > { %v1306_v12 = vpop.f32.mrf.mxu2  ;;  %v1250_v17 = vpop.f32.mrf.mxu0 }
  0xd9   : > { %v1307_v16 = vadd.f32 %v1306_v12, %v1278_v8  ;;  %v1279_v22 = vpop.f32.mrf.mxu1  ;;  %v3217_v8 = vld [vmem:[%s4061_s30 + $0x2e0] sm:$0xf] }
  0xda   : > { %v1280_v41 = vadd.f32 %v1279_v22, %v1250_v17  ;;  %v3218_v14 = vor.u32 %v3429_v9, %v3217_v8 }
  0xdb   : > { %v4355_v26 = vadd.f32 %v1307_v16, %v4348_v11  ;;  %v3389_v16 = vld [vmem:[%s4061_s30 + $0x1b0] sm:$0xf0] }
  0xdc   : > { %v3058_v17 = vor.u32 %v3389_v16, %v3057_v15  ;;  %1650 = vmatpush.bf16.msrb.mxu2 %v3218_v14  ;;  %3477 = vmatpush.bf16.msra.mxu3 %v3218_v14 }
  0xdd   : > { %v1797_v36 = vsub.f32 0.0, %v4355_v26 }
  0xde   : > { %v4362_v42 = vpop.f32.mrf.mxu3  ;;  %3469 = vmatpush.bf16.msrb.mxu1 %v3058_v17  ;;  %1621 = vmatpush.bf16.msra.mxu0 %v3058_v17 }
  0xdf   : > { %v1837_v40 = vmul.f32 1.442695, %v1797_v36 }
  0xe0   : > { %v1308_v43 = vpop.f32.mrf.mxu2  ;;  %v1253_v48 = vpop.f32.mrf.mxu0  ;;  %1651 = vmatpush.bf16.msrb.mxu2 %v3198_v39  ;;  %3478 = vmatpush.bf16.msra.mxu3 %v3198_v39 }
  0xe1   : > { %3571 = vpow2.f32 %v1837_v40  ;;  %v1309_v47 = vadd.f32 %v1308_v43, %v1280_v41  ;;  %v1282_v51 = vpop.f32.mrf.mxu1  ;;  %v3037_v40 = vld [vmem:[%s4061_s30 + $0x178] sm:$0xf]  ;;  %v3384_v41 = vld [vmem:[%s4061_s30 + $0x188] sm:$0xf0] }
  0xe2   : > { %v1283_v57 = vadd.f32 %v1282_v51, %v1253_v48  ;;  %v3038_v50 = vor.u32 %v3384_v41, %v3037_v40  ;;  %v3177_v51 = vld [vmem:[%s4061_s30 + $0x290] sm:$0xf] }
  0xe3   : > { %v4369_v53 = vadd.f32 %v1309_v47, %v4348_v11  ;;  %1465 = vmatmul.bf16.gmra.mxu3 %v4243_v4  ;;  %v3178_v55 = vor.u32 %v3419_v52, %v3177_v51 }
  0xe4   : > { %1513 = vmatmul.bf16.gmra.mxu1 %v4168_v23  ;;  %1622 = vmatpush.bf16.msra.mxu0 %v3038_v50 }
  0xe5   : > { %v1802_v56 = vsub.f32 0.0, %v4369_v53  ;;  %1542 = vmatmul.bf16.gmra.mxu2 %v4175_v30  ;;  %3470 = vmatpush.bf16.msrb.mxu1 %v3038_v50 }
  0xe6   : > { %1494 = vmatmul.bf16.gmra.mxu0 %v4245_v5  ;;  %v4380_v0 = vpop.f32.mrf.mxu3  ;;  %1652 = vmatpush.bf16.msrb.mxu2 %v3178_v55 }
  0xe7   : > { %v3572_v62 = vpop.eup %3571  ;;  %v1847_v63 = vmul.f32 1.442695, %v1802_v56  ;;  %v3017_v56 = vld [vmem:[%s4061_s30 + $0x150] sm:$0xf]  ;;  %3479 = vmatpush.bf16.msra.mxu3 %v3178_v55 }
  0xe8   : > { %v4382_v1 = vadd.f32 1.0, %v3572_v62  ;;  %v1311_v2 = vpop.f32.mrf.mxu2  ;;  %v1255_v7 = vpop.f32.mrf.mxu0 }
  0xe9   : > { %3573 = vpow2.f32 %v1847_v63  ;;  %v1312_v6 = vadd.f32 %v1311_v2, %v1283_v57  ;;  %v1284_v12 = vpop.f32.mrf.mxu1  ;;  %v3379_v57 = vld [vmem:[%s4061_s30 + $0x160] sm:$0xf0] }
  0xea   : > { %3575 = vrcp.f32 %v4382_v1  ;;  %v1285_v25 = vadd.f32 %v1284_v12, %v1255_v7  ;;  %v1966_v45 = vand.u32 2147483647, %v4382_v1  ;;  %v1968_v54 = vand.u32 2147483648, %v4382_v1 }
  0xeb   : > { %v4388_v13 = vadd.f32 %v1312_v6, %v4348_v11  ;;  %v3018_v60 = vor.u32 %v3379_v57, %v3017_v56  ;;  %vm1962_vm1 = vweird.f32 %v4382_v1 }
  0xec   : > { %vm1967_vm3 = vcmp.eq.f32.partialorder %v1966_v45, 8.507059e+37  ;;  %v1969_v7 = vor.u32 1.1754944e-38, %v1968_v54 }
  0xed   : > { %v1807_v20 = vsub.f32 0.0, %v4388_v13  ;;  %3471 = vmatpush.bf16.msrb.mxu1 %v3018_v60  ;;  %1623 = vmatpush.bf16.msra.mxu0 %v3018_v60 }
  0xee   : > { %v4393_v29 = vpop.f32.mrf.mxu3 }
  0xef   : > { %v3574_v21 = vpop.eup %3573  ;;  %v1857_v22 = vmul.f32 1.442695, %v1807_v20 }
  0xf0   : > { %v3576_v36 = vpop.eup %3575  ;;  %v4397_v37 = vadd.f32 1.0, %v3574_v21  ;;  %v1313_v38 = vpop.f32.mrf.mxu2 }
  0xf1   : > { %v1958_v43 = vmul.f32 %v3576_v36, %v4382_v1  ;;  %3577 = vpow2.f32 %v1857_v22  ;;  %v1314_v44 = vadd.f32 %v1313_v38, %v1285_v25  ;;  %v1287_v46 = vpop.f32.mrf.mxu1  ;;  %vm1963_vm0 = vweird.f32 %v3576_v36 }
  0xf2   : > { %3579 = vrcp.f32 %v4397_v37  ;;  %vm1964_vm2 = vmor %vm1962_vm1, %vm1963_vm0  ;;  %v1288_v1 = vadd.f32 %v1287_v46, %v4345_v10  ;;  %v2043_v22 = vand.u32 2147483648, %v4397_v37  ;;  %v2041_v25 = vand.u32 2147483647, %v4397_v37 }
  0xf3   : > { %v1959_v47 = vsub.f32 1.0, %v1958_v43  ;;  %v4405_v48 = vadd.f32 %v1314_v44, %v4348_v11  ;;  %v4407_v49 = vpop.f32.mrf.mxu0  ;;  %1566 = vmatmul.bf16.vlgmr.msrb.gmra.mxu3 %v4133_v33  ;;  %vm2037_vm5 = vweird.f32 %v4397_v37 }
  0xf4   : > { %1518 = vmatmul.bf16.gmra.mxu1 %v4126_v28  ;;  %v2044_v40 = vor.u32 1.1754944e-38, %v2043_v22  ;;  %vm2042_vm7 = vcmp.eq.f32.partialorder %v2041_v25, 8.507059e+37 }
  0xf5   : > { %v1960_v58 = vmul.f32 %v3576_v36, %v1959_v47  ;;  %v1812_v59 = vsub.f32 0.0, %v4405_v48  ;;  %1547 = vmatmul.bf16.gmra.mxu2 %v4211_v18 }
  0xf6   : > { %1595 = vmatmul.bf16.vlgmr.msrb.gmra.mxu0 %v4124_v27  ;;  %v4421_v2 = vpop.f32.mrf.mxu3 }
  0xf7   : > { %v3578_v61 = vpop.eup %3577  ;;  %v1961_v62 = vadd.f32 %v3576_v36, %v1960_v58  ;;  %v1867_v63 = vmul.f32 1.442695, %v1812_v59 }
  0xf8   : > { %v3580_v6 = vpop.eup %3579  ;;  %v4424_v8 = vadd.f32 1.0, %v3578_v61  ;;  %v1316_v9 = vpop.f32.mrf.mxu2 }
  0xf9   : > { %v1965_v27 = vsel %vm1964_vm2, %v3576_v36, %v1961_v62  ;;  %v2033_v12 = vmul.f32 %v3580_v6, %v4397_v37  ;;  %3581 = vpow2.f32 %v1867_v63  ;;  %v1289_v15 = vpop.f32.mrf.mxu1  ;;  %v1317_v20 = vadd.f32 %v1316_v9, %v1288_v1 }
  0xfa   : > { %v1970_v14 = vsel %vm1967_vm3, %v1969_v7, %v1965_v27  ;;  %3583 = vrcp.f32 %v4424_v8  ;;  %vm2038_vm4 = vweird.f32 %v3580_v6  ;;  %v1290_v37 = vadd.f32 %v1289_v15, %v4362_v42 }
  0xfb   : > { %v2557_v16 = vmul.f32 %v1970_v14, %v4355_v26  ;;  %v2034_v17 = vsub.f32 1.0, %v2033_v12  ;;  %v4430_v21 = vpop.f32.mrf.mxu0  ;;  %v4440_v34 = vadd.f32 %v1317_v20, %v4348_v11  ;;  %vm2039_vm6 = vmor %vm2037_vm5, %vm2038_vm4  ;;  %v2118_v55 = vand.u32 2147483648, %v4424_v8 }
  0xfc   : > { %v2116_v58 = vand.u32 2147483647, %v4424_v8  ;;  %vm2112_vm9 = vweird.f32 %v4424_v8 }
  0xfd   : > { %2597 = vst [vmem:[%s4435_s19] sm:$0xff] %v2557_v16  ;;  %v2035_v10 = vmul.f32 %v3580_v6, %v2034_v17  ;;  %v1817_v36 = vsub.f32 0.0, %v4440_v34  ;;  %v2119_v62 = vor.u32 1.1754944e-38, %v2118_v55  ;;  %v4497_v55 = vperm.slane %v4338_v3, 1 }
  0xfe   : > { %v4444_v38 = vpop.f32.mrf.mxu3  ;;  %vm2117_vm11 = vcmp.eq.f32.partialorder %v2116_v58, 8.507059e+37 }
  0xff   : > { %v3582_v26 = vpop.eup %3581  ;;  %v2036_v35 = vadd.f32 %v3580_v6, %v2035_v10  ;;  %v1877_v46 = vmul.f32 1.442695, %v1817_v36 }
 0x100   : > { %v3584_v39 = vpop.eup %3583  ;;  %v4446_v41 = vadd.f32 1.0, %v3582_v26  ;;  %v1318_v43 = vpop.f32.mrf.mxu2 }
 0x101   : > { %v2040_v44 = vsel %vm2039_vm6, %v3580_v6, %v2036_v35  ;;  %v2108_v45 = vmul.f32 %v3584_v39, %v4424_v8  ;;  %v1292_v50 = vpop.f32.mrf.mxu1  ;;  %v1319_v56 = vadd.f32 %v1318_v43, %v1290_v37  ;;  %vm2113_vm8 = vweird.f32 %v3584_v39 }
 0x102   : > { %v2045_v47 = vsel %vm2042_vm7, %v2044_v40, %v2040_v44  ;;  %3585 = vrcp.f32 %v4446_v41  ;;  %v1293_v59 = vadd.f32 %v1292_v50, %v4380_v0  ;;  %vm2114_vm10 = vmor %vm2112_vm9, %vm2113_vm8  ;;  %v2191_v20 = vand.u32 2147483647, %v4446_v41 }
 0x103   : > { %v2562_v51 = vmul.f32 %v2045_v47, %v4369_v53  ;;  %v2109_v52 = vsub.f32 1.0, %v2108_v45  ;;  %3587 = vpow2.f32 %v1877_v46  ;;  %v4452_v54 = vpop.f32.mrf.mxu0  ;;  %1571 = vmatmul.bf16.gmra.mxu3 %v4177_v31  ;;  %v4461_v42 = vadd.f32 %v1319_v56, %v4348_v11 }
 0x104   : > { %1523 = vmatmul.bf16.gmra.mxu1 %v4170_v24  ;;  %v2193_v22 = vand.u32 2147483648, %v4446_v41  ;;  %vm2187_vm13 = vweird.f32 %v4446_v41  ;;  %vm2192_vm15 = vcmp.eq.f32.partialorder %v2191_v20, 8.507059e+37  ;;  %v1365_v47 = vadd.f32 %v4407_v49, %v4421_v2 }
 0x105   : > { %2602 = vst [vmem:[%s4435_s19 + $0x28] sm:$0xff] %v2562_v51  ;;  %v2110_v57 = vmul.f32 %v3584_v39, %v2109_v52  ;;  %1552 = vmatmul.bf16.gmra.mxu2 %v4243_v4  ;;  %v1822_v63 = vsub.f32 0.0, %v4461_v42 }
 0x106   : > { %1600 = vmatmul.bf16.gmra.mxu0 %v4168_v23  ;;  %v4466_v60 = vpop.f32.mrf.mxu3 }
 0x107   : > { %v2111_v53 = vadd.f32 %v3584_v39, %v2110_v57  ;;  %v1887_v8 = vmul.f32 1.442695, %v1822_v63 }
 0x108   : > { %v3586_v61 = vpop.eup %3585  ;;  %v1321_v6 = vpop.f32.mrf.mxu2 }
 0x109   : > { %v3588_v7 = vpop.eup %3587  ;;  %v2115_v9 = vsel %vm2114_vm10, %v3584_v39, %v2111_v53  ;;  %v2183_v27 = vmul.f32 %v3586_v61, %v4446_v41  ;;  %v1322_v23 = vadd.f32 %v1321_v6, %v1293_v59  ;;  %v1294_v0 = vpop.f32.mrf.mxu1  ;;  %vm2188_vm12 = vweird.f32 %v3586_v61 }
 0x10a   : > { %v2120_v12 = vsel %vm2117_vm11, %v2119_v62, %v2115_v9  ;;  %v4470_v1 = vadd.f32 1.0, %v3588_v7  ;;  %v1295_v35 = vadd.f32 %v1294_v0, %v4393_v29  ;;  %vm2189_vm14 = vmor %vm2187_vm13, %vm2188_vm12  ;;  %v2194_v39 = vor.u32 1.1754944e-38, %v2193_v22 }
 0x10b   : > { %v2567_v14 = vmul.f32 %v2120_v12, %v4388_v13  ;;  %v2184_v15 = vsub.f32 1.0, %v2183_v27  ;;  %v4474_v16 = vadd.f32 %v1322_v23, %v4348_v11  ;;  %v4476_v17 = vpop.f32.mrf.mxu0 }
 0x10c   : > { %3589 = vrcp.f32 %v4470_v1  ;;  %vm2262_vm1 = vweird.f32 %v4470_v1 }
 0x10d   : > { %2607 = vst [vmem:[%s4435_s19 + $0x50] sm:$0xff] %v2567_v14  ;;  %v2185_v10 = vmul.f32 %v3586_v61, %v2184_v15  ;;  %3591 = vpow2.f32 %v1887_v8  ;;  %v1827_v25 = vsub.f32 0.0, %v4474_v16 }
 0x10e   : > { %v4485_v36 = vpop.f32.mrf.mxu3 }
 0x10f   : > { %v2186_v26 = vadd.f32 %v3586_v61, %v2185_v10  ;;  %v1897_v13 = vmul.f32 1.442695, %v1827_v25 }
 0x110   : > { %v1323_v40 = vpop.f32.mrf.mxu2 }
 0x111   : > { %v2190_v43 = vsel %vm2189_vm14, %v3586_v61, %v2186_v26  ;;  %3593 = vpow2.f32 %v1897_v13  ;;  %v1324_v44 = vadd.f32 %v1323_v40, %v1295_v35  ;;  %v1393_v37 = vpop.f32.mrf.mxu1 }
 0x112   : > { %v3590_v45 = vpop.eup %3589  ;;  %v2195_v46 = vsel %vm2192_vm15, %v2194_v39, %v2190_v43  ;;  %v1394_v57 = vadd.f32 %v1393_v37, %v1365_v47  ;;  %v1370_v43 = vadd.f32 %v4452_v54, %v4466_v60 }
 0x113   : > { %v3592_v41 = vpop.eup %3591  ;;  %v2572_v50 = vmul.f32 %v2195_v46, %v4405_v48  ;;  %v2258_v29 = vmul.f32 %v3590_v45, %v4470_v1  ;;  %v4492_v51 = vadd.f32 %v1324_v44, %v4348_v11  ;;  %v4494_v52 = vpop.f32.mrf.mxu0  ;;  %1576 = vmatmul.bf16.gmra.mxu3 %v4213_v19  ;;  %v2266_v11 = vand.u32 2147483647, %v4470_v1 }
 0x114   : > { %v4499_v56 = vadd.f32 1.0, %v3592_v41  ;;  %1629 = vmatmul.bf16.vlgmr.msrb.gmra.mxu1 %v4175_v30  ;;  %v2268_v48 = vand.u32 2147483648, %v4470_v1  ;;  %vm2263_vm0 = vweird.f32 %v3590_v45  ;;  %v4511_v61 = vadd.f32 %v1394_v57, %v4497_v55 }
 0x115   : > { %2612 = vst [vmem:[%s4435_s19 + $0x78] sm:$0xff] %v2572_v50  ;;  %v2259_v49 = vsub.f32 1.0, %v2258_v29  ;;  %v1832_v2 = vsub.f32 0.0, %v4492_v51  ;;  %1653 = vmatmul.bf16.vlgmr.msrb.gmra.mxu2 %v4133_v33  ;;  %v1367_v33 = vadd.f32 %v4430_v21, %v4444_v38  ;;  %vm2264_vm2 = vmor %vm2262_vm1, %vm2263_vm0  ;;  %vm2267_vm3 = vcmp.eq.f32.partialorder %v2266_v11, 8.507059e+37 }
 0x116   : > { %3595 = vrcp.f32 %v4499_v56  ;;  %1605 = vmatmul.bf16.gmra.mxu0 %v4126_v28  ;;  %v4513_v62 = vpop.f32.mrf.mxu3  ;;  %v1798_v28 = vsub.f32 0.0, %v4511_v61  ;;  %v2269_v7 = vor.u32 1.1754944e-38, %v2268_v48  ;;  %v2341_v14 = vand.u32 2147483647, %v4499_v56 }
 0x117   : > { %v3594_v58 = vpop.eup %3593  ;;  %v2260_v53 = vmul.f32 %v3590_v45, %v2259_v49  ;;  %v1907_v59 = vmul.f32 1.442695, %v1832_v2  ;;  %v2343_v15 = vand.u32 2147483648, %v4499_v56  ;;  %vm2337_vm5 = vweird.f32 %v4499_v56 }
 0x118   : > { %v4517_v30 = vadd.f32 1.0, %v3594_v58  ;;  %v4519_v63 = vpop.f32.mrf.mxu2  ;;  %v1839_v23 = vmul.f32 1.442695, %v1798_v28  ;;  %vm4545_vm6 = vcmp.eq.f32.partialorder %v2341_v14, 8.507059e+37 }
 0x119   : > { %v2261_v6 = vadd.f32 %v3590_v45, %v2260_v53  ;;  %3597 = vpow2.f32 %v1907_v59  ;;  %v1395_v9 = vpop.f32.mrf.mxu1 }
 0x11a   : > { %3599 = vrcp.f32 %v4517_v30  ;;  %v1396_v38 = vadd.f32 %v1395_v9, %v1367_v33  ;;  %v2416_v54 = vand.u32 2147483647, %v4517_v30  ;;  %v2418_v60 = vand.u32 2147483648, %v4517_v30 }
 0x11b   : > { %v2265_v27 = vsel %vm2264_vm2, %v3590_v45, %v2261_v6  ;;  %v4524_v21 = vpop.f32.mrf.mxu0  ;;  %3601 = vpow2.f32 %v1839_v23  ;;  %v2344_v45 = vor.u32 1.1754944e-38, %v2343_v15  ;;  %vm2412_vm9 = vweird.f32 %v4517_v30 }
 0x11c   : > { %v3596_v12 = vpop.eup %3595  ;;  %v2270_v8 = vsel %vm2267_vm3, %v2269_v7, %v2265_v27  ;;  %v4531_v20 = vadd.f32 %v1396_v38, %v4497_v55  ;;  %vm2417_vm11 = vcmp.eq.f32.partialorder %v2416_v54, 8.507059e+37 }
 0x11d   : > { %v2577_v0 = vmul.f32 %v2270_v8, %v4440_v34  ;;  %v2333_v1 = vmul.f32 %v3596_v12, %v4499_v56  ;;  %vm2338_vm4 = vweird.f32 %v3596_v12 }
 0x11e   : > { %v4534_v25 = vpop.f32.mrf.mxu3  ;;  %v1803_v34 = vsub.f32 0.0, %v4531_v20  ;;  %vm2339_vm7 = vmor %vm2337_vm5, %vm2338_vm4 }
 0x11f   : > { %v3598_v22 = vpop.eup %3597  ;;  %2617 = vst [vmem:[%s4435_s19 + $0xa0] sm:$0xff] %v2577_v0  ;;  %v2334_v10 = vsub.f32 1.0, %v2333_v1 }
 0x120   : > { %v3600_v26 = vpop.eup %3599  ;;  %v4536_v13 = vadd.f32 1.0, %v3598_v22  ;;  %v4539_v35 = vpop.f32.mrf.mxu2  ;;  %v1849_v50 = vmul.f32 1.442695, %v1803_v34 }
 0x121   : > { %v2335_v39 = vmul.f32 %v3596_v12, %v2334_v10  ;;  %v2408_v40 = vmul.f32 %v3600_v26, %v4517_v30  ;;  %v1398_v46 = vpop.f32.mrf.mxu1  ;;  %v3602_v47 = vpop.eup %3601  ;;  %vm2413_vm8 = vweird.f32 %v3600_v26 }
 0x122   : > { %3603 = vrcp.f32 %v4536_v13  ;;  %v1399_v57 = vadd.f32 %v1398_v46, %v1370_v43  ;;  %v4554_v56 = vadd.f32 1.0, %v3602_v47  ;;  %vm2414_vm10 = vmor %vm2412_vm9, %vm2413_vm8  ;;  %v2491_v1 = vand.u32 2147483647, %v4536_v13 }
 0x123   : > { %v2336_v37 = vadd.f32 %v3596_v12, %v2335_v39  ;;  %v2409_v41 = vsub.f32 1.0, %v2408_v40  ;;  %v4550_v29 = vpop.f32.mrf.mxu0  ;;  %1581 = vmatmul.bf16.gmra.mxu3 %v4245_v5  ;;  %3605 = vpow2.f32 %v1849_v50  ;;  %v2493_v14 = vand.u32 2147483648, %v4536_v13 }
 0x124   : > { %v4558_v11 = vadd.f32 %v1399_v57, %v4497_v55  ;;  %1634 = vmatmul.bf16.gmra.mxu1 %v4211_v18  ;;  %3607 = vrcp.f32 %v4554_v56  ;;  %vm2487_vm13 = vweird.f32 %v4536_v13  ;;  %vm2492_vm15 = vcmp.eq.f32.partialorder %v2491_v1, 8.507059e+37 }
 0x125   : > { %v2340_v49 = vsel %vm2339_vm7, %v3596_v12, %v2336_v37  ;;  %v2410_v2 = vmul.f32 %v3600_v26, %v2409_v41  ;;  %1658 = vmatmul.bf16.gmra.mxu2 %v4177_v31  ;;  %v2419_v31 = vor.u32 1.1754944e-38, %v2418_v60  ;;  %v2494_v39 = vor.u32 1.1754944e-38, %v2493_v14 }
 0x126   : > { %v2345_v48 = vsel %vm4545_vm6, %v2344_v45, %v2340_v49  ;;  %1610 = vmatmul.bf16.gmra.mxu0 %v4170_v24  ;;  %v1808_v59 = vsub.f32 0.0, %v4558_v11  ;;  %v4569_v33 = vpop.f32.mrf.mxu3  ;;  %v1981_v40 = vand.u32 2147483647, %v4554_v56  ;;  %v1983_v43 = vand.u32 2147483648, %v4554_v56 }
 0x127   : > { %v2582_v58 = vmul.f32 %v2345_v48, %v4461_v42  ;;  %v2411_v53 = vadd.f32 %v3600_v26, %v2410_v2  ;;  %v1372_v42 = vadd.f32 %v4476_v17, %v4485_v36  ;;  %vm1977_vm1 = vweird.f32 %v4554_v56 }
 0x128   : > { %v3604_v6 = vpop.eup %3603  ;;  %v4572_v18 = vpop.f32.mrf.mxu2  ;;  %v1859_v7 = vmul.f32 1.442695, %v1808_v59  ;;  %v1375_v41 = vadd.f32 %v4494_v52, %v4513_v62  ;;  %v1984_v48 = vor.u32 1.1754944e-38, %v1983_v43  ;;  %vm1982_vm3 = vcmp.eq.f32.partialorder %v1981_v40, 8.507059e+37 }
 0x129   : > { %2622 = vst [vmem:[%s4435_s19 + $0xc8] sm:$0xff] %v2582_v58  ;;  %v2415_v28 = vsel %vm2414_vm10, %v3600_v26, %v2411_v53  ;;  %v2483_v24 = vmul.f32 %v3604_v6, %v4536_v13  ;;  %v1400_v9 = vpop.f32.mrf.mxu1  ;;  %v3606_v27 = vpop.eup %3605  ;;  %vm2488_vm12 = vweird.f32 %v3604_v6 }
 0x12a   : > { %v2420_v30 = vsel %vm2417_vm11, %v2419_v31, %v2415_v28  ;;  %v1401_v8 = vadd.f32 %v1400_v9, %v1372_v42  ;;  %v3608_v0 = vpop.eup %3607  ;;  %v4583_v15 = vadd.f32 1.0, %v3606_v27  ;;  %3609 = vpow2.f32 %v1859_v7  ;;  %vm2489_vm14 = vmor %vm2487_vm13, %vm2488_vm12 }
 0x12b   : > { %v2587_v23 = vmul.f32 %v2420_v30, %v4474_v16  ;;  %v2484_v38 = vsub.f32 1.0, %v2483_v24  ;;  %v4579_v12 = vpop.f32.mrf.mxu0  ;;  %v1973_v36 = vmul.f32 %v3608_v0, %v4554_v56  ;;  %vm1978_vm0 = vweird.f32 %v3608_v0 }
 0x12c   : > { %v4588_v22 = vadd.f32 %v1401_v8, %v4497_v55  ;;  %3611 = vrcp.f32 %v4583_v15  ;;  %vm1979_vm2 = vmor %vm1977_vm1, %vm1978_vm0  ;;  %v1377_v31 = vadd.f32 %v4524_v21, %v4534_v25  ;;  %v4628_v30 = vperm.slane %v4338_v3, 2 }
 0x12d   : > { %2627 = vst [vmem:[%s4435_s19 + $0xf0] sm:$0xff] %v2587_v23  ;;  %v2485_v17 = vmul.f32 %v3604_v6, %v2484_v38  ;;  %v1974_v10 = vsub.f32 1.0, %v1973_v36  ;;  %vm2052_vm5 = vweird.f32 %v4583_v15 }
 0x12e   : > { %v1813_v26 = vsub.f32 0.0, %v4588_v22  ;;  %v4593_v34 = vpop.f32.mrf.mxu3 }
 0x12f   : > { %v2486_v16 = vadd.f32 %v3604_v6, %v2485_v17  ;;  %v1975_v46 = vmul.f32 %v3608_v0, %v1974_v10 }
 0x130   : > { %v4597_v44 = vpop.f32.mrf.mxu2  ;;  %v1869_v47 = vmul.f32 1.442695, %v1813_v26  ;;  %v3610_v13 = vpop.eup %3609 }
 0x131   : > { %v2490_v45 = vsel %vm2489_vm14, %v3604_v6, %v2486_v16  ;;  %v1403_v50 = vpop.f32.mrf.mxu1  ;;  %v1976_v54 = vadd.f32 %v3608_v0, %v1975_v46  ;;  %v4603_v60 = vadd.f32 1.0, %v3610_v13  ;;  %v2058_v6 = vand.u32 2147483648, %v4583_v15 }
 0x132   : > { %v2495_v37 = vsel %vm2492_vm15, %v2494_v39, %v2490_v45  ;;  %3613 = vpow2.f32 %v1869_v47  ;;  %v3612_v2 = vpop.eup %3611  ;;  %v1404_v58 = vadd.f32 %v1403_v50, %v1375_v41 }
 0x133   : > { %v2592_v57 = vmul.f32 %v2495_v37, %v4492_v51  ;;  %v1480_v49 = vpop.f32.mrf.mxu0  ;;  %1668 = vmatmul.bf16.vlgmr.msra.gmra.mxu3 %v4245_v5  ;;  %v1980_v53 = vsel %vm1979_vm2, %v3608_v0, %v1976_v54  ;;  %v2048_v52 = vmul.f32 %v3612_v2, %v4583_v15  ;;  %3615 = vrcp.f32 %v4603_v60 }
 0x134   : > { %1639 = vmatmul.bf16.gmra.mxu1 %v4243_v4  ;;  %v1985_v51 = vsel %vm1982_vm3, %v1984_v48, %v1980_v53  ;;  %v4614_v5 = vadd.f32 %v1404_v58, %v4497_v55  ;;  %vm2053_vm4 = vweird.f32 %v3612_v2  ;;  %v2059_v38 = vor.u32 1.1754944e-38, %v2058_v6 }
 0x135   : > { %2632 = vst [vmem:[%s4435_s19 + $0x118] sm:$0xff] %v2592_v57  ;;  %1663 = vmatmul.bf16.gmra.mxu2 %v4213_v19  ;;  %v2558_v62 = vmul.f32 %v1985_v51, %v4511_v61  ;;  %v2049_v56 = vsub.f32 1.0, %v2048_v52  ;;  %vm2054_vm6 = vmor %vm2052_vm5, %vm2053_vm4  ;;  %v2131_v36 = vand.u32 2147483647, %v4603_v60  ;;  %v2133_v16 = vand.u32 2147483648, %v4603_v60 }
 0x136   : > { %1624 = vmatmul.bf16.vlgmr.msra.gmra.mxu0 %v4131_v32  ;;  %v1451_v59 = vpop.f32.mrf.mxu3  ;;  %v2056_v32 = vand.u32 2147483647, %v4583_v15  ;;  %v1818_v61 = vsub.f32 0.0, %v4614_v5  ;;  %vm2127_vm9 = vweird.f32 %v4603_v60 }
 0x137   : > { %v1452_v4 = vadd.f32 %v1451_v59, %v4519_v63  ;;  %2598 = vst [vmem:[%s4435_s19 + $0x8] sm:$0xff] %v2558_v62  ;;  %v2050_v24 = vmul.f32 %v3612_v2, %v2049_v56  ;;  %vm2132_vm11 = vcmp.eq.f32.partialorder %v2131_v36, 8.507059e+37  ;;  %v2134_v54 = vor.u32 1.1754944e-38, %v2133_v16 }
 0x138   : > { %v4619_v28 = vpop.f32.mrf.mxu2  ;;  %v3614_v19 = vpop.eup %3613  ;;  %v1879_v63 = vmul.f32 1.442695, %v1818_v61  ;;  %vm2057_vm7 = vcmp.eq.f32.partialorder %v2056_v32, 8.507059e+37 }
 0x139   : > { %v4625_v42 = vadd.f32 1.0, %v3614_v19  ;;  %v1481_v7 = vadd.f32 %v1480_v49, %v1452_v4  ;;  %v1405_v9 = vpop.f32.mrf.mxu1  ;;  %v3616_v21 = vpop.eup %3615  ;;  %v2051_v25 = vadd.f32 %v3612_v2, %v2050_v24  ;;  %v1382_v4 = vadd.f32 %v4579_v12, %v4593_v34 }
 0x13a   : > { %v1406_v27 = vadd.f32 %v1405_v9, %v1377_v31  ;;  %v2123_v8 = vmul.f32 %v3616_v21, %v4603_v60  ;;  %vm2128_vm8 = vweird.f32 %v3616_v21 }
 0x13b   : > { %v1482_v23 = vpop.f32.mrf.mxu0  ;;  %3617 = vrcp.f32 %v4625_v42  ;;  %v2055_v0 = vsel %vm2054_vm6, %v3612_v2, %v2051_v25  ;;  %v4634_v14 = vadd.f32 %v1481_v7, %v4628_v30  ;;  %vm2129_vm10 = vmor %vm2127_vm9, %vm2128_vm8  ;;  %v2206_v51 = vand.u32 2147483647, %v4625_v42 }
 0x13c   : > { %3619 = vpow2.f32 %v1879_v63  ;;  %v2060_v3 = vsel %vm2057_vm7, %v2059_v38, %v2055_v0  ;;  %v2124_v1 = vsub.f32 1.0, %v2123_v8  ;;  %v4637_v15 = vadd.f32 %v1406_v27, %v4497_v55 }
 0x13d   : > { %v2563_v17 = vmul.f32 %v2060_v3, %v4531_v20  ;;  %v1799_v39 = vsub.f32 0.0, %v4634_v14  ;;  %v1380_v20 = vadd.f32 %v4550_v29, %v4569_v33  ;;  %v2208_v62 = vand.u32 2147483648, %v4625_v42 }
 0x13e   : > { %v1453_v10 = vpop.f32.mrf.mxu3  ;;  %v2125_v26 = vmul.f32 %v3616_v21, %v2124_v1  ;;  %v1823_v40 = vsub.f32 0.0, %v4637_v15  ;;  %vm2202_vm13 = vweird.f32 %v4625_v42  ;;  %vm2207_vm15 = vcmp.eq.f32.partialorder %v2206_v51, 8.507059e+37 }
 0x13f   : > { %v1454_v45 = vadd.f32 %v1453_v10, %v4539_v35  ;;  %2603 = vst [vmem:[%s4435_s19 + $0x30] sm:$0xff] %v2563_v17  ;;  %v1841_v13 = vmul.f32 1.442695, %v1799_v39  ;;  %v2209_v9 = vor.u32 1.1754944e-38, %v2208_v62 }
 0x140   : > { %v4644_v43 = vpop.f32.mrf.mxu2  ;;  %v2126_v47 = vadd.f32 %v3616_v21, %v2125_v26  ;;  %v1889_v37 = vmul.f32 1.442695, %v1823_v40 }
 0x141   : > { %v3618_v46 = vpop.eup %3617  ;;  %v1483_v41 = vadd.f32 %v1482_v23, %v1454_v45  ;;  %v1408_v50 = vpop.f32.mrf.mxu1  ;;  %3621 = vpow2.f32 %v1841_v13 }
 0x142   : > { %v3620_v57 = vpop.eup %3619  ;;  %v2198_v49 = vmul.f32 %v3618_v46, %v4625_v42  ;;  %v1409_v35 = vadd.f32 %v1408_v50, %v1380_v20  ;;  %v2130_v48 = vsel %vm2129_vm10, %v3616_v21, %v2126_v47  ;;  %3623 = vpow2.f32 %v1889_v37 }
 0x143   : > { %v1485_v2 = vpop.f32.mrf.mxu0  ;;  %v4653_v60 = vadd.f32 1.0, %v3620_v57  ;;  %v4656_v29 = vadd.f32 %v1483_v41, %v4628_v30  ;;  %v2135_v33 = vsel %vm2132_vm11, %v2134_v54, %v2130_v48  ;;  %vm2203_vm12 = vweird.f32 %v3618_v46 }
 0x144   : > { %v2199_v58 = vsub.f32 1.0, %v2198_v49  ;;  %v4659_v53 = vadd.f32 %v1409_v35, %v4497_v55  ;;  %v2568_v52 = vmul.f32 %v2135_v33, %v4558_v11  ;;  %vm2204_vm14 = vmor %vm2202_vm13, %vm2203_vm12 }
 0x145   : > { %3625 = vrcp.f32 %v4653_v60  ;;  %v1804_v59 = vsub.f32 0.0, %v4656_v29  ;;  %v2281_v21 = vand.u32 2147483647, %v4653_v60  ;;  %v2283_v34 = vand.u32 2147483648, %v4653_v60 }
 0x146   : > { %v2200_v56 = vmul.f32 %v3618_v46, %v2199_v58  ;;  %v1828_v6 = vsub.f32 0.0, %v4659_v53  ;;  %v1456_v31 = vpop.f32.mrf.mxu3  ;;  %2608 = vst [vmem:[%s4435_s19 + $0x58] sm:$0xff] %v2568_v52  ;;  %vm2277_vm0 = vweird.f32 %v4653_v60 }
 0x147   : > { %v1457_v11 = vadd.f32 %v1456_v31, %v4572_v18  ;;  %v1851_v32 = vmul.f32 1.442695, %v1804_v59  ;;  %v3622_v7 = vpop.eup %3621  ;;  %vm4689_vm1 = vcmp.eq.f32.partialorder %v2281_v21, 8.507059e+37  ;;  %v2284_v26 = vor.u32 1.1754944e-38, %v2283_v34 }
 0x148   : > { %v4670_v19 = vpop.f32.mrf.mxu2  ;;  %v2201_v24 = vadd.f32 %v3618_v46, %v2200_v56  ;;  %v1899_v61 = vmul.f32 1.442695, %v1828_v6  ;;  %v3624_v27 = vpop.eup %3623  ;;  %v4676_v23 = vadd.f32 1.0, %v3622_v7 }
 0x149   : > { %v1486_v25 = vadd.f32 %v1485_v2, %v1457_v11  ;;  %v1410_v63 = vpop.f32.mrf.mxu1  ;;  %3627 = vpow2.f32 %v1851_v32  ;;  %v4678_v8 = vadd.f32 1.0, %v3624_v27 }
 0x14a   : > { %v2205_v12 = vsel %vm2204_vm14, %v3618_v46, %v2201_v24  ;;  %3629 = vpow2.f32 %v1899_v61  ;;  %v1411_v17 = vadd.f32 %v1410_v63, %v1382_v4  ;;  %vm1992_vm3 = vweird.f32 %v4676_v23 }
 0x14b   : > { %v1487_v18 = vpop.f32.mrf.mxu0  ;;  %v3626_v42 = vpop.eup %3625  ;;  %v2210_v38 = vsel %vm2207_vm15, %v2209_v9, %v2205_v12  ;;  %v4681_v0 = vadd.f32 %v1486_v25, %v4628_v30  ;;  %3631 = vrcp.f32 %v4676_v23  ;;  %v1996_v13 = vand.u32 2147483647, %v4676_v23 }
 0x14c   : > { %v2573_v3 = vmul.f32 %v2210_v38, %v4588_v22  ;;  %v2273_v1 = vmul.f32 %v3626_v42, %v4653_v60  ;;  %3633 = vrcp.f32 %v4678_v8  ;;  %vm2278_vm2 = vweird.f32 %v3626_v42 }
 0x14d   : > { %v1809_v39 = vsub.f32 0.0, %v4681_v0  ;;  %v4697_v20 = vadd.f32 %v1411_v17, %v4497_v55  ;;  %v1998_v37 = vand.u32 2147483648, %v4676_v23  ;;  %vm2352_vm4 = vweird.f32 %v4678_v8  ;;  %vm2279_vm5 = vmor %vm2277_vm0, %vm2278_vm2 }
 0x14e   : > { %2613 = vst [vmem:[%s4435_s19 + $0x80] sm:$0xff] %v2573_v3  ;;  %v2274_v36 = vsub.f32 1.0, %v2273_v1  ;;  %v1458_v16 = vpop.f32.mrf.mxu3  ;;  %v2356_v55 = vand.u32 2147483647, %v4678_v8  ;;  %v2358_v48 = vand.u32 2147483648, %v4678_v8  ;;  %vm4721_vm6 = vcmp.eq.f32.partialorder %v1996_v13, 8.507059e+37 }
 0x14f   : > { %v3628_v40 = vpop.eup %3627  ;;  %v1459_v46 = vadd.f32 %v1458_v16, %v4597_v44  ;;  %v1861_v33 = vmul.f32 1.442695, %v1809_v39  ;;  %v1833_v51 = vsub.f32 0.0, %v4697_v20  ;;  %v1999_v31 = vor.u32 1.1754944e-38, %v1998_v37 }
 0x150   : > { %v4694_v22 = vpop.f32.mrf.mxu2  ;;  %v2275_v45 = vmul.f32 %v3626_v42, %v2274_v36  ;;  %v3630_v47 = vpop.eup %3629  ;;  %v4703_v41 = vadd.f32 1.0, %v3628_v40  ;;  %vm4727_vm7 = vcmp.eq.f32.partialorder %v2356_v55, 8.507059e+37  ;;  %v2359_v61 = vor.u32 1.1754944e-38, %v2358_v48 }
 0x151   : > { %v4705_v50 = vpop.f32.mrf.mxu1  ;;  %v3632_v57 = vpop.eup %3631  ;;  %v4709_v49 = vadd.f32 1.0, %v3630_v47  ;;  %v1488_v62 = vadd.f32 %v1487_v18, %v1459_v46  ;;  %v1909_v21 = vmul.f32 1.442695, %v1833_v51 }
 0x152   : > { %v2276_v54 = vadd.f32 %v3626_v42, %v2275_v45  ;;  %v3634_v35 = vpop.eup %3633  ;;  %v1988_v2 = vmul.f32 %v3632_v57, %v4676_v23  ;;  %3635 = vrcp.f32 %v4703_v41  ;;  %vm1993_vm8 = vweird.f32 %v3632_v57 }
 0x153   : > { %v1490_v44 = vpop.f32.mrf.mxu0  ;;  %v2348_v52 = vmul.f32 %v3634_v35, %v4678_v8  ;;  %3637 = vrcp.f32 %v4709_v49  ;;  %vm2353_vm9 = vweird.f32 %v3634_v35  ;;  %v4735_v25 = vadd.f32 %v1488_v62, %v4628_v30  ;;  %vm1994_vm11 = vmor %vm1992_vm3, %vm1993_vm8 }
 0x154   : > { %v2280_v58 = vsel %vm2279_vm5, %v3626_v42, %v2276_v54  ;;  %v1989_v59 = vsub.f32 1.0, %v1988_v2  ;;  %3639 = vpow2.f32 %v1861_v33  ;;  %vm2067_vm10 = vweird.f32 %v4703_v41  ;;  %vm2354_vm12 = vmor %vm2352_vm4, %vm2353_vm9 }
 0x155   : > { %v2285_v56 = vsel %vm4689_vm1, %v2284_v26, %v2280_v58  ;;  %v2349_v4 = vsub.f32 1.0, %v2348_v52  ;;  %v2071_v27 = vand.u32 2147483647, %v4703_v41  ;;  %v2073_v38 = vand.u32 2147483648, %v4703_v41 }
 0x156   : > { %v2578_v6 = vmul.f32 %v2285_v56, %v4614_v5  ;;  %v1461_v24 = vpop.f32.mrf.mxu3  ;;  %v1990_v32 = vmul.f32 %v3632_v57, %v1989_v59  ;;  %3641 = vpow2.f32 %v1909_v21  ;;  %v1814_v36 = vsub.f32 0.0, %v4735_v25 }
 0x157   : > { %v2350_v9 = vmul.f32 %v3634_v35, %v2349_v4  ;;  %v1462_v12 = vadd.f32 %v1461_v24, %v4619_v28  ;;  %v2431_v28 = vand.u32 2147483647, %v4709_v49  ;;  %v2433_v55 = vand.u32 2147483648, %v4709_v49 }
 0x158   : > { %v4731_v7 = vpop.f32.mrf.mxu2  ;;  %2618 = vst [vmem:[%s4435_s19 + $0xa8] sm:$0xff] %v2578_v6  ;;  %v3636_v5 = vpop.eup %3635  ;;  %v1991_v63 = vadd.f32 %v3632_v57, %v1990_v32  ;;  %v1871_v8 = vmul.f32 1.442695, %v1814_v36  ;;  %vm2072_vm0 = vcmp.eq.f32.partialorder %v2071_v27, 8.507059e+37  ;;  %v2074_v58 = vor.u32 1.1754944e-38, %v2073_v38 }
 0x159   : > { %v4740_v34 = vpop.f32.mrf.mxu1  ;;  %v2351_v18 = vadd.f32 %v3634_v35, %v2350_v9  ;;  %v2063_v42 = vmul.f32 %v3636_v5, %v4703_v41  ;;  %v3638_v1 = vpop.eup %3637  ;;  %v1491_v23 = vadd.f32 %v1490_v44, %v1462_v12  ;;  %vm2068_vm13 = vweird.f32 %v3636_v5 }
 0x15a   : > { %v1995_v17 = vsel %vm1994_vm11, %v3632_v57, %v1991_v63  ;;  %v2423_v39 = vmul.f32 %v3638_v1, %v4709_v49  ;;  %v3640_v46 = vpop.eup %3639  ;;  %3643 = vpow2.f32 %v1871_v8  ;;  %vm2428_vm14 = vweird.f32 %v3638_v1  ;;  %vm2069_vm15 = vmor %vm2067_vm10, %vm2068_vm13 }
 0x15b   : > { %v1492_v3 = vpop.f32.mrf.mxu0  ;;  %v2000_v16 = vsel %vm4721_vm6, %v1999_v31, %v1995_v17  ;;  %v2355_v10 = vsel %vm2354_vm12, %v3634_v35, %v2351_v18  ;;  %v2064_v26 = vsub.f32 1.0, %v2063_v42  ;;  %v4760_v57 = vadd.f32 %v1491_v23, %v4628_v30 }
 0x15c   : > { %v2559_v40 = vmul.f32 %v2000_v16, %v4634_v14  ;;  %v2360_v45 = vsel %vm4727_vm7, %v2359_v61, %v2355_v10  ;;  %v2424_v37 = vsub.f32 1.0, %v2423_v39  ;;  %v4764_v44 = vadd.f32 1.0, %v3640_v46  ;;  %v3642_v2 = vpop.eup %3641 }
 0x15d   : > { %v2583_v47 = vmul.f32 %v2360_v45, %v4637_v15  ;;  %v2065_v13 = vmul.f32 %v3636_v5, %v2064_v26  ;;  %v1819_v33 = vsub.f32 0.0, %v4760_v57  ;;  %vm2427_vm1 = vweird.f32 %v4709_v49 }
 0x15e   : > { %v1463_v54 = vpop.f32.mrf.mxu3  ;;  %2599 = vst [vmem:[%s4435_s19 + $0x10] sm:$0xff] %v2559_v40  ;;  %v2425_v15 = vmul.f32 %v3638_v1, %v2424_v37  ;;  %3645 = vrcp.f32 %v4764_v44  ;;  %v4778_v62 = vadd.f32 1.0, %v3642_v2  ;;  %vm2429_vm2 = vmor %vm2427_vm1, %vm2428_vm14  ;;  %v2434_v6 = vor.u32 1.1754944e-38, %v2433_v55 }
 0x15f   : > { %v1464_v14 = vadd.f32 %v1463_v54, %v4644_v43  ;;  %2623 = vst [vmem:[%s4435_s19 + $0xd0] sm:$0xff] %v2583_v47  ;;  %v2066_v48 = vadd.f32 %v3636_v5, %v2065_v13  ;;  %v1881_v56 = vmul.f32 1.442695, %v1819_v33  ;;  %vm2432_vm3 = vcmp.eq.f32.partialorder %v2431_v28, 8.507059e+37 }
 0x160   : > { %v4767_v35 = vpop.f32.mrf.mxu2  ;;  %v2426_v51 = vadd.f32 %v3638_v1, %v2425_v15  ;;  %3647 = vrcp.f32 %v4778_v62  ;;  %v3644_v49 = vpop.eup %3643  ;;  %v2146_v27 = vand.u32 2147483647, %v4764_v44  ;;  %v2508_v28 = vand.u32 2147483648, %v4778_v62 }
 0x161   : > { %v4776_v43 = vpop.f32.mrf.mxu1  ;;  %v2070_v52 = vsel %vm2069_vm15, %v3636_v5, %v2066_v48  ;;  %v1493_v41 = vadd.f32 %v1492_v3, %v1464_v14  ;;  %3649 = vpow2.f32 %v1881_v56  ;;  %v4784_v32 = vadd.f32 1.0, %v3644_v49 }
 0x162   : > { %v2075_v60 = vsel %vm2072_vm0, %v2074_v58, %v2070_v52  ;;  %v2430_v4 = vsel %vm2429_vm2, %v3638_v1, %v2426_v51  ;;  %v2148_v3 = vand.u32 2147483648, %v4764_v44  ;;  %vm2142_vm5 = vweird.f32 %v4764_v44 }
 0x163   : > { %v1495_v59 = vpop.f32.mrf.mxu0  ;;  %v2564_v31 = vmul.f32 %v2075_v60, %v4656_v29  ;;  %v2435_v11 = vsel %vm2432_vm3, %v2434_v6, %v2430_v4  ;;  %v4787_v61 = vadd.f32 %v1493_v41, %v4628_v30  ;;  %3651 = vrcp.f32 %v4784_v32 }
 0x164   : > { %v2588_v24 = vmul.f32 %v2435_v11, %v4659_v53  ;;  %v3646_v21 = vpop.eup %3645  ;;  %vm4808_vm6 = vcmp.eq.f32.partialorder %v2146_v27, 8.507059e+37  ;;  %v2149_v8 = vor.u32 1.1754944e-38, %v2148_v3  ;;  %vm2502_vm7 = vweird.f32 %v4778_v62 }
 0x165   : > { %2604 = vst [vmem:[%s4435_s19 + $0x38] sm:$0xff] %v2564_v31  ;;  %v2138_v63 = vmul.f32 %v3646_v21, %v4764_v44  ;;  %v1824_v53 = vsub.f32 0.0, %v4787_v61  ;;  %vm2143_vm4 = vweird.f32 %v3646_v21  ;;  %v2506_v13 = vand.u32 2147483647, %v4778_v62 }
 0x166   : > { %v1466_v9 = vpop.f32.mrf.mxu3  ;;  %2628 = vst [vmem:[%s4435_s19 + $0xf8] sm:$0xff] %v2588_v24  ;;  %v3648_v42 = vpop.eup %3647  ;;  %vm2144_vm8 = vmor %vm2142_vm5, %vm2143_vm4  ;;  %v2509_v44 = vor.u32 1.1754944e-38, %v2508_v28  ;;  %v2221_v33 = vand.u32 2147483647, %v4784_v32  ;;  %v2223_v51 = vand.u32 2147483648, %v4784_v32  ;;  %vm2217_vm13 = vweird.f32 %v4784_v32 }
 0x167   : > { %v1467_v5 = vadd.f32 %v1466_v9, %v4670_v19  ;;  %v2139_v38 = vsub.f32 1.0, %v2138_v63  ;;  %v3650_v19 = vpop.eup %3649  ;;  %v2498_v17 = vmul.f32 %v3648_v42, %v4778_v62  ;;  %v1891_v16 = vmul.f32 1.442695, %v1824_v53 }
 0x168   : > { %v4790_v29 = vpop.f32.mrf.mxu2  ;;  %v4802_v23 = vadd.f32 1.0, %v3650_v19  ;;  %vm2503_vm9 = vweird.f32 %v3648_v42  ;;  %vm2507_vm11 = vcmp.eq.f32.partialorder %v2506_v13, 8.507059e+37  ;;  %vm2222_vm15 = vcmp.eq.f32.partialorder %v2221_v33, 8.507059e+37 }
 0x169   : > { %v1496_v12 = vadd.f32 %v1495_v59, %v1467_v5  ;;  %v4797_v18 = vpop.f32.mrf.mxu1  ;;  %v2140_v36 = vmul.f32 %v3646_v21, %v2139_v38  ;;  %v2499_v39 = vsub.f32 1.0, %v2498_v17  ;;  %v3652_v40 = vpop.eup %3651  ;;  %vm2504_vm10 = vmor %vm2502_vm7, %vm2503_vm9  ;;  %v2224_v9 = vor.u32 1.1754944e-38, %v2223_v51  ;;  %v4842_v5 = vld [vmem:[%s4335_s6] sm:$0x1f] }
 0x16a   : > { %3653 = vrcp.f32 %v4802_v23  ;;  %v2213_v37 = vmul.f32 %v3652_v40, %v4784_v32  ;;  %vm2218_vm12 = vweird.f32 %v3652_v40  ;;  %vm2292_vm1 = vweird.f32 %v4802_v23 }
 0x16b   : > { %v1497_v1 = vpop.f32.mrf.mxu0  ;;  %v4805_v10 = vadd.f32 %v1496_v12, %v4628_v30  ;;  %v2141_v45 = vadd.f32 %v3646_v21, %v2140_v36  ;;  %v2500_v47 = vmul.f32 %v3648_v42, %v2499_v39  ;;  %3655 = vpow2.f32 %v1891_v16  ;;  %vm2219_vm14 = vmor %vm2217_vm13, %vm2218_vm12 }
 0x16c   : > { %v2214_v15 = vsub.f32 1.0, %v2213_v37 }
 0x16d   : > { %v2145_v55 = vsel %vm2144_vm8, %v3646_v21, %v2141_v45  ;;  %v1829_v14 = vsub.f32 0.0, %v4805_v10  ;;  %v2501_v48 = vadd.f32 %v3648_v42, %v2500_v47 }
 0x16e   : > { %v1468_v46 = vpop.f32.mrf.mxu3  ;;  %v2150_v2 = vsel %vm4808_vm6, %v2149_v8, %v2145_v55  ;;  %v2215_v41 = vmul.f32 %v3652_v40, %v2214_v15  ;;  %v1541_v8 = vadd.f32 %v4767_v35, %v4740_v34 }
 0x16f   : > { %v2569_v52 = vmul.f32 %v2150_v2, %v4681_v0  ;;  %v1901_v56 = vmul.f32 1.442695, %v1829_v14  ;;  %v1469_v59 = vadd.f32 %v1468_v46, %v4694_v22  ;;  %v2505_v6 = vsel %vm2504_vm10, %v3648_v42, %v2501_v48 }
 0x170   : > { %v4817_v54 = vpop.f32.mrf.mxu2  ;;  %v3654_v31 = vpop.eup %3653  ;;  %v2510_v4 = vsel %vm2507_vm11, %v2509_v44, %v2505_v6  ;;  %v1539_v0 = vadd.f32 %v4731_v7, %v4705_v50  ;;  %v2216_v11 = vadd.f32 %v3652_v40, %v2215_v41  ;;  %v4845_v50 = vperm.slane %v4842_v5, 3 }
 0x171   : > { %v4823_v58 = vpop.f32.mrf.mxu1  ;;  %2609 = vst [vmem:[%s4435_s19 + $0x60] sm:$0xff] %v2569_v52  ;;  %3657 = vpow2.f32 %v1901_v56  ;;  %v1498_v62 = vadd.f32 %v1497_v1, %v1469_v59  ;;  %v2593_v49 = vmul.f32 %v2510_v4, %v4697_v20  ;;  %v2288_v22 = vmul.f32 %v3654_v31, %v4802_v23  ;;  %v3656_v24 = vpop.eup %3655 }
 0x172   : > { %v2220_v20 = vsel %vm2219_vm14, %v3652_v40, %v2216_v11  ;;  %v1944_v27 = vadd.f32 1.0, %v3656_v24  ;;  %v2296_v42 = vand.u32 2147483647, %v4802_v23  ;;  %vm2293_vm0 = vweird.f32 %v3654_v31 }
 0x173   : > { %v4830_v60 = vpop.f32.mrf.mxu0  ;;  %v4839_v21 = vadd.f32 %v1498_v62, %v4628_v30  ;;  %2633 = vst [vmem:[%s4435_s19 + $0x120] sm:$0xff] %v2593_v49  ;;  %v2289_v63 = vsub.f32 1.0, %v2288_v22  ;;  %v2225_v12 = vsel %vm2222_vm15, %v2224_v9, %v2220_v20  ;;  %v2298_v30 = vand.u32 2147483648, %v4802_v23  ;;  %vm2294_vm2 = vmor %vm2292_vm1, %vm2293_vm0 }
 0x174   : > { %v2574_v3 = vmul.f32 %v2225_v12, %v4735_v25  ;;  %3659 = vrcp.f32 %v1944_v27  ;;  %vm2297_vm3 = vcmp.eq.f32.partialorder %v2296_v42, 8.507059e+37  ;;  %v2371_v2 = vand.u32 2147483647, %v1944_v27 }
 0x175   : > { %v1834_v38 = vsub.f32 0.0, %v4839_v21  ;;  %v2290_v1 = vmul.f32 %v3654_v31, %v2289_v63  ;;  %v2299_v25 = vor.u32 1.1754944e-38, %v2298_v30  ;;  %v2373_v33 = vand.u32 2147483648, %v1944_v27 }
 0x176   : > { %v1567_v7 = vpop.f32.mrf.mxu3  ;;  %2614 = vst [vmem:[%s4435_s19 + $0x88] sm:$0xff] %v2574_v3  ;;  %vm2367_vm5 = vweird.f32 %v1944_v27  ;;  %vm4884_vm6 = vcmp.eq.f32.partialorder %v2371_v2, 8.507059e+37 }
 0x177   : > { %v1568_v53 = vadd.f32 %v1567_v7, %v1539_v0  ;;  %v3658_v17 = vpop.eup %3657  ;;  %v1911_v28 = vmul.f32 1.442695, %v1834_v38  ;;  %v2291_v26 = vadd.f32 %v3654_v31, %v2290_v1  ;;  %v2374_v62 = vor.u32 1.1754944e-38, %v2373_v33 }
 0x178   : > { %v4848_v32 = vpop.f32.mrf.mxu2  ;;  %v4863_v39 = vadd.f32 1.0, %v3658_v17 }
 0x179   : > { %v4854_v19 = vpop.f32.mrf.mxu1  ;;  %v4857_v36 = vadd.f32 %v1568_v53, %v4845_v50  ;;  %3661 = vpow2.f32 %v1911_v28  ;;  %v2295_v45 = vsel %vm2294_vm2, %v3654_v31, %v2291_v26  ;;  %v1544_v31 = vadd.f32 %v4790_v29, %v4776_v43 }
 0x17a   : > { %3663 = vrcp.f32 %v4863_v39  ;;  %v2300_v46 = vsel %vm2297_vm3, %v2299_v25, %v2295_v45  ;;  %v3660_v37 = vpop.eup %3659  ;;  %v2446_v24 = vand.u32 2147483647, %v4863_v39  ;;  %v2448_v9 = vand.u32 2147483648, %v4863_v39 }
 0x17b   : > { %v4859_v16 = vpop.f32.mrf.mxu0  ;;  %v1800_v40 = vsub.f32 0.0, %v4857_v36  ;;  %v2579_v23 = vmul.f32 %v2300_v46, %v4760_v57  ;;  %v2363_v14 = vmul.f32 %v3660_v37, %v1944_v27  ;;  %vm2368_vm4 = vweird.f32 %v3660_v37 }
 0x17c   : > { %vm2369_vm7 = vmor %vm2367_vm5, %vm2368_vm4  ;;  %vm2442_vm9 = vweird.f32 %v4863_v39  ;;  %v2449_v1 = vor.u32 1.1754944e-38, %v2448_v9  ;;  %vm2447_vm11 = vcmp.eq.f32.partialorder %v2446_v24, 8.507059e+37 }
 0x17d   : > { %v1843_v47 = vmul.f32 1.442695, %v1800_v40  ;;  %2619 = vst [vmem:[%s4435_s19 + $0xb0] sm:$0xff] %v2579_v23  ;;  %v2364_v35 = vsub.f32 1.0, %v2363_v14 }
 0x17e   : > { %v1569_v13 = vpop.f32.mrf.mxu3 }
 0x17f   : > { %v1570_v44 = vadd.f32 %v1569_v13, %v1541_v8  ;;  %3665 = vpow2.f32 %v1843_v47  ;;  %v3662_v34 = vpop.eup %3661  ;;  %v2365_v59 = vmul.f32 %v3660_v37, %v2364_v35 }
 0x180   : > { %v4870_v55 = vpop.f32.mrf.mxu2  ;;  %v3664_v51 = vpop.eup %3663  ;;  %v4880_v56 = vadd.f32 1.0, %v3662_v34 }
 0x181   : > { %v4874_v48 = vadd.f32 %v1570_v44, %v4845_v50  ;;  %v4876_v15 = vpop.f32.mrf.mxu1  ;;  %v2438_v6 = vmul.f32 %v3664_v51, %v4863_v39  ;;  %v2366_v0 = vadd.f32 %v3660_v37, %v2365_v59  ;;  %vm2443_vm8 = vweird.f32 %v3664_v51 }
 0x182   : > { %3667 = vrcp.f32 %v4880_v56  ;;  %vm2444_vm10 = vmor %vm2442_vm9, %vm2443_vm8  ;;  %v2521_v8 = vand.u32 2147483647, %v4880_v56  ;;  %v2523_v13 = vand.u32 2147483648, %v4880_v56  ;;  %vm2517_vm13 = vweird.f32 %v4880_v56 }
 0x183   : > { %v4878_v52 = vpop.f32.mrf.mxu0  ;;  %v1805_v57 = vsub.f32 0.0, %v4874_v48  ;;  %v2439_v49 = vsub.f32 1.0, %v2438_v6  ;;  %v2370_v43 = vsel %vm2369_vm7, %v3660_v37, %v2366_v0 }
 0x184   : > { %v2375_v27 = vsel %vm4884_vm6, %v2374_v62, %v2370_v43  ;;  %vm2522_vm15 = vcmp.eq.f32.partialorder %v2521_v8, 8.507059e+37 }
 0x185   : > { %v3666_v4 = vpop.eup %3665  ;;  %v1853_v11 = vmul.f32 1.442695, %v1805_v57  ;;  %v2440_v29 = vmul.f32 %v3664_v51, %v2439_v49  ;;  %v2584_v12 = vmul.f32 %v2375_v27, %v4787_v61  ;;  %v1546_v61 = vadd.f32 %v4817_v54, %v4797_v18 }
 0x186   : > { %v1572_v22 = vpop.f32.mrf.mxu3  ;;  %v4893_v7 = vadd.f32 1.0, %v3666_v4  ;;  %v1549_v4 = vadd.f32 %v4848_v32, %v4823_v58 }
 0x187   : > { %v1573_v63 = vadd.f32 %v1572_v22, %v1544_v31  ;;  %3669 = vpow2.f32 %v1853_v11  ;;  %v2441_v42 = vadd.f32 %v3664_v51, %v2440_v29  ;;  %2624 = vst [vmem:[%s4435_s19 + $0xd8] sm:$0xff] %v2584_v12 }
 0x188   : > { %v4895_v20 = vpop.f32.mrf.mxu2  ;;  %3671 = vrcp.f32 %v4893_v7  ;;  %v3668_v3 = vpop.eup %3667  ;;  %v2011_v57 = vand.u32 2147483647, %v4893_v7  ;;  %v2013_v59 = vand.u32 2147483648, %v4893_v7  ;;  %vm2007_vm1 = vweird.f32 %v4893_v7 }
 0x189   : > { %v4900_v53 = vpop.f32.mrf.mxu1  ;;  %v4905_v30 = vadd.f32 %v1573_v63, %v4845_v50  ;;  %v2445_v17 = vsel %vm2444_vm10, %v3664_v51, %v2441_v42  ;;  %v2513_v28 = vmul.f32 %v3668_v3, %v4880_v56  ;;  %vm2518_vm12 = vweird.f32 %v3668_v3 }
 0x18a   : > { %v2450_v26 = vsel %vm2447_vm11, %v2449_v1, %v2445_v17  ;;  %vm2519_vm14 = vmor %vm2517_vm13, %vm2518_vm12  ;;  %v2524_v51 = vor.u32 1.1754944e-38, %v2523_v13  ;;  %v2014_v24 = vor.u32 1.1754944e-38, %v2013_v59  ;;  %vm2012_vm3 = vcmp.eq.f32.partialorder %v2011_v57, 8.507059e+37 }
 0x18b   : > { %v4907_v38 = vpop.f32.mrf.mxu0  ;;  %v1810_v39 = vsub.f32 0.0, %v4905_v30  ;;  %v2589_v40 = vmul.f32 %v2450_v26, %v4805_v10  ;;  %v2514_v45 = vsub.f32 1.0, %v2513_v28 }
 0x18d   : > { %v3670_v25 = vpop.eup %3669  ;;  %v1863_v23 = vmul.f32 1.442695, %v1810_v39  ;;  %2629 = vst [vmem:[%s4435_s19 + $0x100] sm:$0xff] %v2589_v40  ;;  %v2515_v18 = vmul.f32 %v3668_v3, %v2514_v45 }
 0x18e   : > { %v1574_v46 = vpop.f32.mrf.mxu3  ;;  %v3672_v47 = vpop.eup %3671  ;;  %v4917_v37 = vadd.f32 1.0, %v3670_v25 }
 0x18f   : > { %v1575_v14 = vadd.f32 %v1574_v46, %v1546_v61  ;;  %v2003_v54 = vmul.f32 %v3672_v47, %v4893_v7  ;;  %v2516_v2 = vadd.f32 %v3668_v3, %v2515_v18  ;;  %vm2008_vm0 = vweird.f32 %v3672_v47 }
 0x190   : > { %v4919_v44 = vpop.f32.mrf.mxu2  ;;  %3673 = vrcp.f32 %v4917_v37  ;;  %vm2009_vm2 = vmor %vm2007_vm1, %vm2008_vm0  ;;  %v2088_v1 = vand.u32 2147483648, %v4917_v37  ;;  %v2086_v28 = vand.u32 2147483647, %v4917_v37  ;;  %v1551_v61 = vadd.f32 %v4870_v55, %v4854_v19 }
 0x191   : > { %v4925_v10 = vpop.f32.mrf.mxu1  ;;  %v2004_v34 = vsub.f32 1.0, %v2003_v54  ;;  %3675 = vpow2.f32 %v1863_v23  ;;  %v4928_v35 = vadd.f32 %v1575_v14, %v4845_v50  ;;  %v2520_v56 = vsel %vm2519_vm14, %v3668_v3, %v2516_v2 }
 0x192   : > { %v2525_v31 = vsel %vm2522_vm15, %v2524_v51, %v2520_v56  ;;  %vm2082_vm5 = vweird.f32 %v4917_v37  ;;  %v2089_v45 = vor.u32 1.1754944e-38, %v2088_v1  ;;  %vm2087_vm7 = vcmp.eq.f32.partialorder %v2086_v28, 8.507059e+37 }
 0x193   : > { %v4930_v33 = vpop.f32.mrf.mxu0  ;;  %v2005_v6 = vmul.f32 %v3672_v47, %v2004_v34  ;;  %v1815_v41 = vsub.f32 0.0, %v4928_v35  ;;  %v2594_v0 = vmul.f32 %v2525_v31, %v4839_v21  ;;  %v1554_v34 = vadd.f32 %v4895_v20, %v4876_v15 }
 0x195   : > { %v2006_v62 = vadd.f32 %v3672_v47, %v2005_v6  ;;  %v1873_v49 = vmul.f32 1.442695, %v1815_v41  ;;  %2634 = vst [vmem:[%s4435_s19 + $0x128] sm:$0xff] %v2594_v0 }
 0x196   : > { %v1577_v11 = vpop.f32.mrf.mxu3  ;;  %v3674_v22 = vpop.eup %3673 }
 0x197   : > { %v1578_v9 = vadd.f32 %v1577_v11, %v1549_v4  ;;  %v3676_v43 = vpop.eup %3675  ;;  %v2010_v29 = vsel %vm2009_vm2, %v3672_v47, %v2006_v62  ;;  %v2078_v58 = vmul.f32 %v3674_v22, %v4917_v37  ;;  %3677 = vpow2.f32 %v1873_v49 }
 0x198   : > { %v4939_v63 = vpop.f32.mrf.mxu2  ;;  %v2015_v21 = vsel %vm2012_vm3, %v2014_v24, %v2010_v29  ;;  %v1930_v32 = vadd.f32 1.0, %v3676_v43  ;;  %vm2083_vm4 = vweird.f32 %v3674_v22  ;;  %v4980_v49 = vperm.slane %v4842_v5, 4 }
 0x199   : > { %v4944_v7 = vadd.f32 %v1578_v9, %v4845_v50  ;;  %v4946_v27 = vpop.f32.mrf.mxu1  ;;  %v2560_v12 = vmul.f32 %v2015_v21, %v4857_v36  ;;  %v2079_v42 = vsub.f32 1.0, %v2078_v58  ;;  %vm2084_vm6 = vmor %vm2082_vm5, %vm2083_vm4 }
 0x19a   : > { %3679 = vrcp.f32 %v1930_v32  ;;  %v2161_v51 = vand.u32 2147483647, %v1930_v32  ;;  %v2163_v57 = vand.u32 2147483648, %v1930_v32  ;;  %vm2157_vm9 = vweird.f32 %v1930_v32 }
 0x19b   : > { %v4949_v3 = vpop.f32.mrf.mxu0  ;;  %2600 = vst [vmem:[%s4435_s19 + $0x18] sm:$0xff] %v2560_v12  ;;  %v2080_v17 = vmul.f32 %v3674_v22, %v2079_v42  ;;  %v1820_v26 = vsub.f32 0.0, %v4944_v7 }
 0x19c   : > { %vm2162_vm11 = vcmp.eq.f32.partialorder %v2161_v51, 8.507059e+37  ;;  %v2164_v24 = vor.u32 1.1754944e-38, %v2163_v57 }
 0x19d   : > { %v3678_v39 = vpop.eup %3677  ;;  %v2081_v25 = vadd.f32 %v3674_v22, %v2080_v17  ;;  %v1883_v36 = vmul.f32 1.442695, %v1820_v26  ;;  %v1556_v17 = vadd.f32 %v4919_v44, %v4900_v53 }
 0x19e   : > { %v1579_v40 = vpop.f32.mrf.mxu3  ;;  %v4958_v8 = vadd.f32 1.0, %v3678_v39 }
 0x19f   : > { %v1580_v46 = vadd.f32 %v1579_v40, %v1551_v61  ;;  %v2085_v13 = vsel %vm2084_vm6, %v3674_v22, %v2081_v25  ;;  %3681 = vpow2.f32 %v1883_v36 }
 0x1a0   : > { %v4960_v47 = vpop.f32.mrf.mxu2  ;;  %v3680_v23 = vpop.eup %3679  ;;  %v2090_v14 = vsel %vm2087_vm7, %v2089_v45, %v2085_v13  ;;  %3683 = vrcp.f32 %v4958_v8  ;;  %v2236_v58 = vand.u32 2147483647, %v4958_v8  ;;  %v2238_v21 = vand.u32 2147483648, %v4958_v8 }
 0x1a1   : > { %v4963_v19 = vpop.f32.mrf.mxu1  ;;  %v2565_v55 = vmul.f32 %v2090_v14, %v4874_v48  ;;  %v2153_v37 = vmul.f32 %v3680_v23, %v1930_v32  ;;  %v4969_v54 = vadd.f32 %v1580_v46, %v4845_v50  ;;  %vm2158_vm8 = vweird.f32 %v3680_v23 }
 0x1a2   : > { %v1631_v48 = vadd.f32 %v4925_v10, %v4878_v52  ;;  %vm2159_vm10 = vmor %vm2157_vm9, %vm2158_vm8  ;;  %vm2232_vm13 = vweird.f32 %v4958_v8  ;;  %v2239_v36 = vor.u32 1.1754944e-38, %v2238_v21  ;;  %vm2237_vm15 = vcmp.eq.f32.partialorder %v2236_v58, 8.507059e+37 }
 0x1a3   : > { %v4966_v18 = vpop.f32.mrf.mxu0  ;;  %2605 = vst [vmem:[%s4435_s19 + $0x40] sm:$0xff] %v2565_v55  ;;  %v2154_v2 = vsub.f32 1.0, %v2153_v37  ;;  %v1825_v59 = vsub.f32 0.0, %v4969_v54 }
 0x1a5   : > { %v3682_v56 = vpop.eup %3681  ;;  %v2155_v6 = vmul.f32 %v3680_v23, %v2154_v2  ;;  %v1893_v0 = vmul.f32 1.442695, %v1825_v59 }
 0x1a6   : > { %v1582_v41 = vpop.f32.mrf.mxu3  ;;  %v3684_v31 = vpop.eup %3683  ;;  %v4977_v4 = vadd.f32 1.0, %v3682_v56 }
 0x1a7   : > { %v1583_v62 = vadd.f32 %v1582_v41, %v1554_v34  ;;  %v2156_v20 = vadd.f32 %v3680_v23, %v2155_v6  ;;  %v2228_v11 = vmul.f32 %v3684_v31, %v4958_v8  ;;  %vm2233_vm12 = vweird.f32 %v3684_v31 }
 0x1a8   : > { %v1659_v15 = vpop.f32.mrf.mxu2  ;;  %3685 = vrcp.f32 %v4977_v4  ;;  %vm2234_vm14 = vmor %vm2232_vm13, %vm2233_vm12  ;;  %v2311_v2 = vand.u32 2147483647, %v4977_v4  ;;  %v2313_v34 = vand.u32 2147483648, %v4977_v4  ;;  %vm2307_vm1 = vweird.f32 %v4977_v4 }
 0x1a9   : > { %v1660_v22 = vadd.f32 %v1659_v15, %v1631_v48  ;;  %v2160_v52 = vsel %vm2159_vm10, %v3680_v23, %v2156_v20  ;;  %v2229_v10 = vsub.f32 1.0, %v2228_v11  ;;  %3687 = vpow2.f32 %v1893_v0  ;;  %v4989_v43 = vpop.f32.mrf.mxu1 }
 0x1aa   : > { %v4985_v9 = vadd.f32 %v1583_v62, %v4845_v50  ;;  %v2165_v29 = vsel %vm2162_vm11, %v2164_v24, %v2160_v52  ;;  %vm2312_vm3 = vcmp.eq.f32.partialorder %v2311_v2, 8.507059e+37  ;;  %v2314_v0 = vor.u32 1.1754944e-38, %v2313_v34 }
 0x1ab   : > { %v4987_v5 = vpop.f32.mrf.mxu0  ;;  %v4994_v32 = vadd.f32 %v1660_v22, %v4980_v49  ;;  %v2570_v12 = vmul.f32 %v2165_v29, %v4905_v30  ;;  %v2230_v42 = vmul.f32 %v3684_v31, %v2229_v10  ;;  %v1633_v30 = vadd.f32 %v4946_v27, %v4907_v38 }
 0x1ac   : > { %v1830_v1 = vsub.f32 0.0, %v4985_v9 }
 0x1ad   : > { %v1811_v28 = vsub.f32 0.0, %v4994_v32  ;;  %2610 = vst [vmem:[%s4435_s19 + $0x68] sm:$0xff] %v2570_v12  ;;  %v2231_v26 = vadd.f32 %v3684_v31, %v2230_v42  ;;  %v1636_v42 = vadd.f32 %v4963_v19, %v4930_v33 }
 0x1ae   : > { %v1903_v61 = vmul.f32 1.442695, %v1830_v1  ;;  %v1584_v39 = vpop.f32.mrf.mxu3  ;;  %v3686_v25 = vpop.eup %3685  ;;  %v5039_v1 = vadd.f32 %v4989_v43, %v4949_v3 }
 0x1af   : > { %v1865_v40 = vmul.f32 1.442695, %v1811_v28  ;;  %v1585_v45 = vadd.f32 %v1584_v39, %v1556_v17  ;;  %v3688_v13 = vpop.eup %3687  ;;  %v2235_v53 = vsel %vm2234_vm14, %v3684_v31, %v2231_v26  ;;  %v2303_v44 = vmul.f32 %v3686_v25, %v4977_v4 }
 0x1b0   : > { %v1661_v46 = vpop.f32.mrf.mxu2  ;;  %3689 = vpow2.f32 %v1903_v61  ;;  %v2240_v23 = vsel %vm2237_vm15, %v2239_v36, %v2235_v53  ;;  %v5006_v8 = vadd.f32 1.0, %v3688_v13  ;;  %vm2308_vm0 = vweird.f32 %v3686_v25 }
 0x1b1   : > { %3691 = vpow2.f32 %v1865_v40  ;;  %v5009_v14 = vadd.f32 %v1585_v45, %v4845_v50  ;;  %v2575_v55 = vmul.f32 %v2240_v23, %v4928_v35  ;;  %v2304_v38 = vsub.f32 1.0, %v2303_v44  ;;  %v1640_v50 = vpop.f32.mrf.mxu1  ;;  %vm2309_vm2 = vmor %vm2307_vm1, %vm2308_vm0 }
 0x1b2   : > { %v1662_v27 = vadd.f32 %v1661_v46, %v1633_v30  ;;  %3693 = vrcp.f32 %v5006_v8  ;;  %v1641_v15 = vadd.f32 %v1640_v50, %v4966_v18  ;;  %v2386_v52 = vand.u32 2147483647, %v5006_v8 }
 0x1b3   : > { %v1625_v37 = vpop.f32.mrf.mxu0  ;;  %2615 = vst [vmem:[%s4435_s19 + $0x90] sm:$0xff] %v2575_v55  ;;  %v2305_v51 = vmul.f32 %v3686_v25, %v2304_v38  ;;  %v1835_v57 = vsub.f32 0.0, %v5009_v14  ;;  %v2388_v12 = vand.u32 2147483648, %v5006_v8  ;;  %vm2382_vm4 = vweird.f32 %v5006_v8 }
 0x1b4   : > { %v5018_v59 = vadd.f32 %v1662_v27, %v4980_v49  ;;  %v1626_v35 = vadd.f32 %v1625_v37, %v4830_v60  ;;  %vm5044_vm5 = vcmp.eq.f32.partialorder %v2386_v52, 8.507059e+37 }
 0x1b5   : > { %v2306_v6 = vadd.f32 %v3686_v25, %v2305_v51  ;;  %v1913_v48 = vmul.f32 1.442695, %v1835_v57  ;;  %v2389_v36 = vor.u32 1.1754944e-38, %v2388_v12 }
 0x1b6   : > { %v3690_v56 = vpop.eup %3689  ;;  %v1816_v41 = vsub.f32 0.0, %v5018_v59  ;;  %v1669_v20 = vpop.f32.mrf.mxu3  ;;  %v1655_v10 = vadd.f32 %v4939_v63, %v1626_v35 }
 0x1b7   : > { %v3692_v31 = vpop.eup %3691  ;;  %v5023_v62 = vadd.f32 1.0, %v3690_v56  ;;  %v2310_v11 = vsel %vm2309_vm2, %v3686_v25, %v2306_v6  ;;  %3695 = vpow2.f32 %v1913_v48  ;;  %v1670_v21 = vadd.f32 %v1669_v20, %v1641_v15 }
 0x1b8   : > { %v5026_v22 = vadd.f32 1.0, %v3692_v31  ;;  %v1875_v60 = vmul.f32 1.442695, %v1816_v41  ;;  %v3694_v24 = vpop.eup %3693  ;;  %v2315_v4 = vsel %vm2312_vm3, %v2314_v0, %v2310_v11  ;;  %v1664_v18 = vpop.f32.mrf.mxu2  ;;  %v5050_v19 = vadd.f32 %v1655_v10, %v4980_v49 }
 0x1b9   : > { %3697 = vrcp.f32 %v5023_v62  ;;  %v2580_v29 = vmul.f32 %v2315_v4, %v4944_v7  ;;  %v2378_v58 = vmul.f32 %v3694_v24, %v5006_v8  ;;  %v2461_v63 = vand.u32 2147483647, %v5023_v62  ;;  %v1642_v51 = vpop.f32.mrf.mxu1 }
 0x1ba   : > { %3699 = vrcp.f32 %v5026_v22  ;;  %v2463_v33 = vand.u32 2147483648, %v5023_v62  ;;  %v1665_v26 = vadd.f32 %v1664_v18, %v1636_v42  ;;  %vm2383_vm6 = vweird.f32 %v3694_v24 }
 0x1bb   : > { %2620 = vst [vmem:[%s4435_s19 + $0xb8] sm:$0xff] %v2580_v29  ;;  %v2379_v17 = vsub.f32 1.0, %v2378_v58  ;;  %3701 = vpow2.f32 %v1875_v60  ;;  %v1627_v7 = vpop.f32.mrf.mxu0  ;;  %v2176_v61 = vand.u32 2147483647, %v5026_v22  ;;  %v5054_v39 = vadd.f32 %v1670_v21, %v4980_v49  ;;  %vm2384_vm10 = vmor %vm2382_vm4, %vm2383_vm6 }
 0x1bc   : > { %vm2457_vm7 = vweird.f32 %v5023_v62  ;;  %v1628_v40 = vadd.f32 %v1627_v7, %v4859_v16  ;;  %vm5061_vm8 = vcmp.eq.f32.partialorder %v2461_v63, 8.507059e+37  ;;  %vm2172_vm9 = vweird.f32 %v5026_v22 }
 0x1bd   : > { %v3696_v3 = vpop.eup %3695  ;;  %v2380_v43 = vmul.f32 %v3694_v24, %v2379_v17  ;;  %v1801_v53 = vsub.f32 0.0, %v5050_v19  ;;  %v2464_v23 = vor.u32 1.1754944e-38, %v2463_v33  ;;  %v2178_v55 = vand.u32 2147483648, %v5026_v22 }
 0x1be   : > { %v5057_v30 = vadd.f32 1.0, %v3696_v3  ;;  %v5072_v16 = vadd.f32 %v1665_v26, %v4980_v49  ;;  %vm5075_vm11 = vcmp.eq.f32.partialorder %v2176_v61, 8.507059e+37  ;;  %v1831_v8 = vsub.f32 0.0, %v5054_v39  ;;  %v1671_v58 = vpop.f32.mrf.mxu3 }
 0x1bf   : > { %v3698_v25 = vpop.eup %3697  ;;  %v2381_v45 = vadd.f32 %v3694_v24, %v2380_v43  ;;  %v1657_v35 = vadd.f32 %v4960_v47, %v1628_v40  ;;  %v1845_v41 = vmul.f32 1.442695, %v1801_v53  ;;  %v2179_v31 = vor.u32 1.1754944e-38, %v2178_v55 }
 0x1c0   : > { %v2453_v46 = vmul.f32 %v3698_v25, %v5023_v62  ;;  %v3700_v44 = vpop.eup %3699  ;;  %3703 = vrcp.f32 %v5057_v30  ;;  %vm2458_vm12 = vweird.f32 %v3698_v25  ;;  %v1643_v0 = vadd.f32 %v1642_v51, %v4987_v5  ;;  %v1666_v5 = vpop.f32.mrf.mxu2 }
 0x1c1   : > { %v3702_v38 = vpop.eup %3701  ;;  %v2385_v27 = vsel %vm2384_vm10, %v3694_v24, %v2381_v45  ;;  %v2168_v2 = vmul.f32 %v3700_v44, %v5026_v22  ;;  %vm2173_vm13 = vweird.f32 %v3700_v44  ;;  %v1821_v11 = vsub.f32 0.0, %v5072_v16  ;;  %vm2459_vm14 = vmor %vm2457_vm7, %vm2458_vm12 }
 0x1c2   : > { %v2454_v37 = vsub.f32 1.0, %v2453_v46  ;;  %v2390_v57 = vsel %vm5044_vm5, %v2389_v36, %v2385_v27  ;;  %v5082_v50 = vadd.f32 1.0, %v3702_v38  ;;  %vm2532_vm15 = vweird.f32 %v5057_v30  ;;  %vm2174_vm0 = vmor %vm2172_vm9, %vm2173_vm13 }
 0x1c3   : > { %v2585_v56 = vmul.f32 %v2390_v57, %v4969_v54  ;;  %v2169_v48 = vsub.f32 1.0, %v2168_v2  ;;  %v2536_v47 = vand.u32 2147483647, %v5057_v30  ;;  %v1905_v54 = vmul.f32 1.442695, %v1831_v8 }
 0x1c4   : > { %v2455_v6 = vmul.f32 %v3698_v25, %v2454_v37  ;;  %3705 = vrcp.f32 %v5082_v50  ;;  %v5096_v24 = vadd.f32 %v1657_v35, %v4980_v49  ;;  %v2538_v29 = vand.u32 2147483648, %v5057_v30 }
 0x1c5   : > { %2625 = vst [vmem:[%s4435_s19 + $0xe0] sm:$0xff] %v2585_v56  ;;  %v2170_v20 = vmul.f32 %v3700_v44, %v2169_v48  ;;  %3707 = vpow2.f32 %v1845_v41  ;;  %v1885_v18 = vmul.f32 1.442695, %v1821_v11  ;;  %v1667_v63 = vadd.f32 %v1666_v5, %v5039_v1 }
 0x1c6   : > { %v2456_v15 = vadd.f32 %v3698_v25, %v2455_v6  ;;  %v3704_v60 = vpop.eup %3703  ;;  %3709 = vpow2.f32 %v1905_v54  ;;  %v1806_v21 = vsub.f32 0.0, %v5096_v24  ;;  %v1672_v26 = vadd.f32 %v1671_v58, %v1643_v0 }
 0x1c7   : > { %v2171_v52 = vadd.f32 %v3700_v44, %v2170_v20  ;;  %v2528_v10 = vmul.f32 %v3704_v60, %v5057_v30  ;;  %3711 = vpow2.f32 %v1885_v18  ;;  %vm2533_vm1 = vweird.f32 %v3704_v60 }
 0x1c8   : > { %v2460_v4 = vsel %vm2459_vm14, %v3698_v25, %v2456_v15  ;;  %v1855_v33 = vmul.f32 1.442695, %v1806_v21  ;;  %vm5113_vm2 = vcmp.eq.f32.partialorder %v2536_v47, 8.507059e+37  ;;  %v2539_v1 = vor.u32 1.1754944e-38, %v2538_v29  ;;  %vm2534_vm3 = vmor %vm2532_vm15, %vm2533_vm1 }
 0x1c9   : > { %v2465_v62 = vsel %vm5061_vm8, %v2464_v23, %v2460_v4  ;;  %v2175_v42 = vsel %vm2174_vm0, %v3700_v44, %v2171_v52  ;;  %v2529_v17 = vsub.f32 1.0, %v2528_v10  ;;  %v5118_v36 = vadd.f32 %v1667_v63, %v4980_v49 }
 0x1ca   : > { %v2590_v12 = vmul.f32 %v2465_v62, %v4985_v9  ;;  %v3706_v7 = vpop.eup %3705  ;;  %v2180_v28 = vsel %vm5075_vm11, %v2179_v31, %v2175_v42  ;;  %v2251_v46 = vand.u32 2147483647, %v5082_v50  ;;  %3713 = vpow2.f32 %v1855_v33 }
 0x1cb   : > { %v3708_v22 = vpop.eup %3707  ;;  %v2571_v3 = vmul.f32 %v2180_v28, %v4994_v32  ;;  %v2530_v43 = vmul.f32 %v3704_v60, %v2529_v17  ;;  %v2243_v9 = vmul.f32 %v3706_v7, %v5082_v50  ;;  %vm2248_vm4 = vweird.f32 %v3706_v7 }
 0x1cc   : > { %2630 = vst [vmem:[%s4435_s19 + $0x108] sm:$0xff] %v2590_v12  ;;  %v1921_v25 = vadd.f32 1.0, %v3708_v22  ;;  %v3710_v32 = vpop.eup %3709  ;;  %v2253_v13 = vand.u32 2147483648, %v5082_v50  ;;  %v5126_v53 = vadd.f32 %v1672_v26, %v4980_v49  ;;  %v1826_v38 = vsub.f32 0.0, %v5118_v36 }
 0x1cd   : > { %2611 = vst [vmem:[%s4435_s19 + $0x70] sm:$0xff] %v2571_v3  ;;  %v2531_v40 = vadd.f32 %v3704_v60, %v2530_v43  ;;  %v2244_v45 = vsub.f32 1.0, %v2243_v9  ;;  %v5128_v55 = vadd.f32 1.0, %v3710_v32  ;;  %v3712_v27 = vpop.eup %3711  ;;  %vm2247_vm5 = vweird.f32 %v5082_v50 }
 0x1ce   : > { %3715 = vrcp.f32 %v1921_v25  ;;  %v5135_v34 = vadd.f32 1.0, %v3712_v27  ;;  %vm2249_vm6 = vmor %vm2247_vm5, %vm2248_vm4  ;;  %v2254_v49 = vor.u32 1.1754944e-38, %v2253_v13  ;;  %v1895_v8 = vmul.f32 1.442695, %v1826_v38 }
 0x1cf   : > { %v2535_v44 = vsel %vm2534_vm3, %v3704_v60, %v2531_v40  ;;  %v2245_v23 = vmul.f32 %v3706_v7, %v2244_v45  ;;  %3717 = vrcp.f32 %v5128_v55  ;;  %v1836_v51 = vsub.f32 0.0, %v5126_v53 }
 0x1d0   : > { %v2540_v37 = vsel %vm5113_vm2, %v2539_v1, %v2535_v44  ;;  %v3714_v57 = vpop.eup %3713  ;;  %vm2252_vm7 = vcmp.eq.f32.partialorder %v2251_v46, 8.507059e+37  ;;  %3719 = vrcp.f32 %v5135_v34  ;;  %v2026_v48 = vand.u32 2147483647, %v1921_v25 }
 0x1d1   : > { %v2595_v30 = vmul.f32 %v2540_v37, %v5009_v14  ;;  %v2246_v2 = vadd.f32 %v3706_v7, %v2245_v23  ;;  %v2028_v41 = vand.u32 2147483648, %v1921_v25  ;;  %v5143_v31 = vadd.f32 1.0, %v3714_v57 }
 0x1d2   : > { %3721 = vpow2.f32 %v1895_v8  ;;  %v1915_v0 = vmul.f32 1.442695, %v1836_v51  ;;  %vm2022_vm8 = vweird.f32 %v1921_v25  ;;  %vm5148_vm10 = vcmp.eq.f32.partialorder %v2026_v48, 8.507059e+37 }
 0x1d3   : > { %2635 = vst [vmem:[%s4435_s19 + $0x130] sm:$0xff] %v2595_v30  ;;  %v2250_v35 = vsel %vm2249_vm6, %v3706_v7, %v2246_v2  ;;  %3723 = vrcp.f32 %v5143_v31  ;;  %v2029_v54 = vor.u32 1.1754944e-38, %v2028_v41  ;;  %vm2472_vm11 = vweird.f32 %v5128_v55 }
 0x1d4   : > { %v3716_v50 = vpop.eup %3715  ;;  %v2255_v14 = vsel %vm2252_vm7, %v2254_v49, %v2250_v35  ;;  %3725 = vpow2.f32 %v1915_v0  ;;  %v2476_v10 = vand.u32 2147483647, %v5128_v55  ;;  %v2478_v29 = vand.u32 2147483648, %v5128_v55 }
 0x1d5   : > { %v2576_v56 = vmul.f32 %v2255_v14, %v5018_v59  ;;  %v2018_v6 = vmul.f32 %v3716_v50, %v1921_v25  ;;  %v3718_v15 = vpop.eup %3717  ;;  %vm2023_vm9 = vweird.f32 %v3716_v50  ;;  %v2326_v18 = vand.u32 2147483647, %v5135_v34 }
 0x1d6   : > { %v2468_v11 = vmul.f32 %v3718_v15, %v5128_v55  ;;  %v3720_v60 = vpop.eup %3719  ;;  %vm2024_vm12 = vmor %vm2022_vm8, %vm2023_vm9  ;;  %vm2473_vm13 = vweird.f32 %v3718_v15  ;;  %vm2322_vm14 = vweird.f32 %v5135_v34  ;;  %v2328_v42 = vand.u32 2147483648, %v5135_v34 }
 0x1d7   : > { %2616 = vst [vmem:[%s4435_s19 + $0x98] sm:$0xff] %v2576_v56  ;;  %v2019_v20 = vsub.f32 1.0, %v2018_v6  ;;  %v2318_v5 = vmul.f32 %v3720_v60, %v5135_v34  ;;  %vm2323_vm15 = vweird.f32 %v3720_v60  ;;  %vm2474_vm0 = vmor %vm2472_vm11, %vm2473_vm13  ;;  %v2479_v3 = vor.u32 1.1754944e-38, %v2478_v29 }
 0x1d8   : > { %v2469_v4 = vsub.f32 1.0, %v2468_v11  ;;  %v3722_v58 = vpop.eup %3721  ;;  %vm2327_vm1 = vcmp.eq.f32.partialorder %v2326_v18, 8.507059e+37  ;;  %vm2477_vm2 = vcmp.eq.f32.partialorder %v2476_v10, 8.507059e+37  ;;  %vm2324_vm3 = vmor %vm2322_vm14, %vm2323_vm15  ;;  %v2329_v1 = vor.u32 1.1754944e-38, %v2328_v42 }
 0x1d9   : > { %v2020_v47 = vmul.f32 %v3716_v50, %v2019_v20  ;;  %v2319_v62 = vsub.f32 1.0, %v2318_v5  ;;  %v1946_v17 = vadd.f32 1.0, %v3722_v58  ;;  %v3724_v63 = vpop.eup %3723  ;;  %v2101_v32 = vand.u32 2147483647, %v5143_v31 }
 0x1da   : > { %v2470_v21 = vmul.f32 %v3718_v15, %v2469_v4  ;;  %v3726_v26 = vpop.eup %3725  ;;  %v2093_v43 = vmul.f32 %v3724_v63, %v5143_v31  ;;  %v2103_v13 = vand.u32 2147483648, %v5143_v31  ;;  %vm2098_vm4 = vweird.f32 %v3724_v63 }
 0x1db   : > { %v2021_v52 = vadd.f32 %v3716_v50, %v2020_v47  ;;  %v2320_v28 = vmul.f32 %v3720_v60, %v2319_v62  ;;  %3727 = vrcp.f32 %v1946_v17  ;;  %v1956_v40 = vadd.f32 1.0, %v3726_v26 }
 0x1dc   : > { %v2471_v33 = vadd.f32 %v3718_v15, %v2470_v21  ;;  %vm2097_vm5 = vweird.f32 %v5143_v31  ;;  %vm2102_vm7 = vcmp.eq.f32.partialorder %v2101_v32, 8.507059e+37  ;;  %v2401_v51 = vand.u32 2147483647, %v1946_v17 }
 0x1dd   : > { %v2025_v12 = vsel %vm2024_vm12, %v3716_v50, %v2021_v52  ;;  %v2321_v9 = vadd.f32 %v3720_v60, %v2320_v28  ;;  %3729 = vrcp.f32 %v1956_v40  ;;  %vm2099_vm6 = vmor %vm2097_vm5, %vm2098_vm4  ;;  %vm2397_vm9 = vweird.f32 %v1946_v17 }
 0x1de   : > { %v2030_v7 = vsel %vm5148_vm10, %v2029_v54, %v2025_v12  ;;  %v2475_v61 = vsel %vm2474_vm0, %v3718_v15, %v2471_v33  ;;  %vm2402_vm11 = vcmp.eq.f32.partialorder %v2401_v51, 8.507059e+37  ;;  %v2553_v6 = vand.u32 2147483648, %v1956_v40 }
 0x1df   : > { %v2561_v22 = vmul.f32 %v2030_v7, %v5050_v19  ;;  %v2480_v25 = vsel %vm2477_vm2, %v2479_v3, %v2475_v61  ;;  %v2094_v19 = vsub.f32 1.0, %v2093_v43  ;;  %v2325_v45 = vsel %vm2324_vm3, %v3720_v60, %v2321_v9 }
 0x1e0   : > { %v2591_v46 = vmul.f32 %v2480_v25, %v5054_v39  ;;  %v2330_v44 = vsel %vm2327_vm1, %v2329_v1, %v2325_v45  ;;  %v2104_v39 = vor.u32 1.1754944e-38, %v2103_v13  ;;  %v2551_v41 = vand.u32 2147483647, %v1956_v40 }
 0x1e1   : > { %2601 = vst [vmem:[%s4435_s19 + $0x20] sm:$0xff] %v2561_v22  ;;  %v2095_v23 = vmul.f32 %v3724_v63, %v2094_v19  ;;  %v2581_v55 = vmul.f32 %v2330_v44, %v5072_v16  ;;  %v3728_v38 = vpop.eup %3727  ;;  %v2403_v16 = vand.u32 2147483648, %v1946_v17  ;;  %vm2547_vm13 = vweird.f32 %v1956_v40 }
 0x1e2   : > { %2631 = vst [vmem:[%s4435_s19 + $0x110] sm:$0xff] %v2591_v46  ;;  %v2393_v37 = vmul.f32 %v3728_v38, %v1946_v17  ;;  %vm2398_vm8 = vweird.f32 %v3728_v38  ;;  %v2554_v20 = vor.u32 1.1754944e-38, %v2553_v6  ;;  %vm2552_vm15 = vcmp.eq.f32.partialorder %v2551_v41, 8.507059e+37 }
 0x1e3   : > { %v2096_v27 = vadd.f32 %v3724_v63, %v2095_v23  ;;  %2621 = vst [vmem:[%s4435_s19 + $0xc0] sm:$0xff] %v2581_v55  ;;  %v3730_v49 = vpop.eup %3729  ;;  %vm2399_vm10 = vmor %vm2397_vm9, %vm2398_vm8  ;;  %v2404_v56 = vor.u32 1.1754944e-38, %v2403_v16 }
 0x1e4   : > { %v2394_v34 = vsub.f32 1.0, %v2393_v37  ;;  %v2543_v35 = vmul.f32 %v3730_v49, %v1956_v40  ;;  %vm2548_vm12 = vweird.f32 %v3730_v49 }
 0x1e5   : > { %v2100_v30 = vsel %vm2099_vm6, %v3724_v63, %v2096_v27  ;;  %vm2549_vm14 = vmor %vm2547_vm13, %vm2548_vm12 }
 0x1e6   : > { %v2105_v2 = vsel %vm2102_vm7, %v2104_v39, %v2100_v30  ;;  %v2395_v57 = vmul.f32 %v3728_v38, %v2394_v34  ;;  %v2544_v14 = vsub.f32 1.0, %v2543_v35 }
 0x1e7   : > { %v2566_v8 = vmul.f32 %v2105_v2, %v5096_v24 }
 0x1e8   : > { %v2396_v50 = vadd.f32 %v3728_v38, %v2395_v57  ;;  %v2545_v48 = vmul.f32 %v3730_v49, %v2544_v14 }
 0x1e9   : > { %2606 = vst [vmem:[%s4435_s19 + $0x48] sm:$0xff] %v2566_v8 }
 0x1ea   : > { %v2400_v24 = vsel %vm2399_vm10, %v3728_v38, %v2396_v50  ;;  %v2546_v15 = vadd.f32 %v3730_v49, %v2545_v48 }
 0x1eb   : > { %v2405_v31 = vsel %vm2402_vm11, %v2404_v56, %v2400_v24 }
 0x1ec   : > { %v2586_v0 = vmul.f32 %v2405_v31, %v5118_v36  ;;  %v2550_v11 = vsel %vm2549_vm14, %v3730_v49, %v2546_v15 }
 0x1ed   : > { %v2555_v60 = vsel %vm2552_vm15, %v2554_v20, %v2550_v11 }
 0x1ee   : > { %2626 = vst [vmem:[%s4435_s19 + $0xe8] sm:$0xff] %v2586_v0  ;;  %v2596_v47 = vmul.f32 %v2555_v60, %v5126_v53 }
 0x1f0   : > { %2636 = vst [vmem:[%s4435_s19 + $0x138] sm:$0xff] %v2596_v47 }
 0x1f1   : > { %3849 = shalt.err (!%p3846_p13)
}
 0x1f2   : > { %s3916_s26 = smov 640   ;;  %s3917_s30 = smov 1280  }
 0x1f3   : > { %s3918_s1 = smov 40  }
 0x1f4   : > { %3493 = dma.vmem_to_hbm [thread:$0]  (%p4021_p0), %s2654_s15, 5120, %s2656_s7, %s2638_s8, %s3916_s26, %s3917_s30, %s3918_s1  }
 0x1f5 PF: > { %s2670_s6 = sand.u32 1, %s3888_s12   ;;  %p3507_p4 = pnand %p2787_p3, %p4025_p2 }
 0x1f6   : > { %s2671_s10 = scalar_lea.sflag [#allocation4], %s2670_s6 }
 0x1f7   : > { %p3508_p5 = pneg %p3507_p4 }
 0x1f9   : > { %3883 = dma.done.wait (%p3508_p5), %s2671_s10, 5120  }
 0x1fa   : > { %3885 = vsyncadd (%p3508_p5), %s2671_s10, 4294962176  ;;  %s20_s17 = sadd.s32 1, %s3908_s17   ;;  %s5255_s12 = smov %s3892_s13 }
 0x1fb   : > { %p17_p1 = scmp.ge.s32.totalorder %s20_s17, 4   ;;  %s5256_s13 = smov %s3896_s14 }
 0x1fc   : > { %s5257_s14 = smov %s3987_s24  ;;  %s5258_s15 = smov %s3904_s16 }
 0x1fd   : > { %s5259_s16 = smov %s5261_s18  ;;  %19 = sbr.rel (!%p17_p1) target bundleno = 10 (0xa), region = 102 }
 0x202   :  { %2677 = vsyncpa [#allocation3], 1 }
 0x203   :  { %2679 = vsyncpa [#allocation3 + $0x1], 1 }
 0x204   :  { %2680 = vsyncpa [#allocation6], 1 }
 0x205   :  { %2682 = vsyncpa [#allocation6 + $0x1], 1 }
 0x206   :  { %2683 = vsyncpa [#allocation4], 1 }
 0x207   :  { %2685 = vsyncpa [#allocation4 + $0x1], 1 }

</bundles_post_ra>
